<compile_context>
chip_gen: v5e
topology: v5e:2x2
jax: 0.10.0
libtpu: 0.0.40
codegen_flags: <defaults>
</compile_context>

<pallas_src>
import functools

import jax
import jax.numpy as jnp
from jax import lax
from jax.experimental import pallas as pl
from jax.experimental.pallas import tpu as pltpu


# ------------------------------ small helpers ------------------------------ #
def _round_up(x, m):
    return (x + m - 1) // m * m


def _row_chunk(total, max_chunk, step=8):
    """Largest multiple-of-`step` divisor of `total` (total % step == 0), <= max_chunk."""
    c = max(step, min(total, max_chunk))
    c = c // step * step
    while total % c:
        c -= step
    return c


def _vmem_limit(*block_bytes):
    """Double-buffered block bytes + headroom; 32 MiB clamp keeps v7x (64 MiB VMEM) happy."""
    est = 2 * sum(int(b) for b in block_bytes) + (2 << 20)
    return int(min(max(est, 4 << 20), 32 << 20))


# ------------------------------ Pallas kernels ------------------------------ #
def _gate_table_kernel(emb_ref, wih_ref, b_ref, tbl_ref):
    """Per-vocab-row gate table: (tv, Ep) @ (Ep, 4Hp) + b  ->  bf16 rows."""
    g = jnp.dot(emb_ref[...], wih_ref[...], preferred_element_type=jnp.float32)
    tbl_ref[...] = (g + b_ref[...]).astype(tbl_ref.dtype)


def _lstm_recurrence_kernel(xg_ref, whh_ref, h0_ref, c0_ref,
                            h_out_ref, c_out_ref, h_sc, c_sc,
                            *, hidden_pad, chunk, seq_len):
    """Serial recurrence over one time-chunk; h/c live in VMEM scratch across the grid."""
    @pl.when(pl.program_id(0) == 0)
    def _():
        h_sc[...] = h0_ref[...]
        c_sc[...] = c0_ref[...]

    whh = whh_ref[...]                       # (Hp, 4Hp) bf16, hoisted once per grid step
    Hp = hidden_pad
    t0 = pl.program_id(0) * chunk
    needs_mask = (seq_len % chunk) != 0      # static (trace-time) flag

    def sigmoid(z):
        # exp on EUP + approx reciprocal on EUP (frees VALU divide cycles)
        return pl.reciprocal(1.0 + jnp.exp(-z), approx=True)

    def step(i, carry):
        h, c = carry
        # Only the hidden projection is on the serial path; x@W_ih + b is a table gather.
        gates = (xg_ref[i].astype(jnp.float32)
                 + jnp.dot(h.astype(whh.dtype), whh,
                           preferred_element_type=jnp.float32))          # (Bp, 4Hp) f32
        i_g = sigmoid(gates[:, 0 * Hp:1 * Hp])   # lane-aligned slices (Hp % 128 == 0)
        f_g = sigmoid(gates[:, 1 * Hp:2 * Hp])
        g_g = jnp.tanh(gates[:, 2 * Hp:3 * Hp])
        o_g = sigmoid(gates[:, 3 * Hp:4 * Hp])
        c_new = f_g * c + i_g * g_g
        h_new = o_g * jnp.tanh(c_new)
        if needs_mask:                         # masked tail chunk for ragged T
            valid = (t0 + i) < seq_len
            h_new = jnp.where(valid, h_new, h)
            c_new = jnp.where(valid, c_new, c)
        return h_new, c_new

    h, c = lax.fori_loop(0, chunk, step, (h_sc[...], c_sc[...]), unroll=True)
    h_sc[...] = h
    c_sc[...] = c

    @pl.when(pl.program_id(0) == pl.num_programs(0) - 1)
    def _():
        h_out_ref[...] = h_sc[...]
        c_out_ref[...] = c_sc[...]


def _fc_kernel(h_ref, wfc_ref, bfc_ref, out_ref):
    """Final FC, tiled over the vocab dim (one lane-dense tile per grid step)."""
    out_ref[...] = (jnp.dot(h_ref[...].astype(wfc_ref.dtype), wfc_ref[...],
                            preferred_element_type=jnp.float32)
                    + bfc_ref[...])


# --------------------------------- wrapper ---------------------------------- #
def init_params(key, num_embeddings, embedding_dim, hidden_size):
    """Deterministic synthetic parameters matching nn.Embedding / nn.LSTM / nn.Linear shapes."""
    ks = jax.random.split(key, 7)
    k = 1.0 / jnp.sqrt(hidden_size)
    emb = jax.random.normal(ks[0], (num_embeddings, embedding_dim), jnp.float32)
    emb = emb.at[0].set(0.0)  # padding_idx=0
    w_ih = jax.random.uniform(ks[1], (4 * hidden_size, embedding_dim), jnp.float32, -k, k)
    w_hh = jax.random.uniform(ks[2], (4 * hidden_size, hidden_size), jnp.float32, -k, k)
    b_ih = jax.random.uniform(ks[3], (4 * hidden_size,), jnp.float32, -k, k)
    b_hh = jax.random.uniform(ks[4], (4 * hidden_size,), jnp.float32, -k, k)
    kf = 1.0 / jnp.sqrt(hidden_size)
    w_fc = jax.random.uniform(ks[5], (num_embeddings, hidden_size), jnp.float32, -kf, kf)
    b_fc = jax.random.uniform(ks[6], (num_embeddings,), jnp.float32, -kf, kf)
    return dict(emb=emb, w_ih=w_ih, w_hh=w_hh, b_ih=b_ih, b_hh=b_hh,
                w_fc=w_fc, b_fc=b_fc)


def lstm_forward(params, input_sequence, state_h, state_c, *, compute_dtype=jnp.bfloat16):
    """Mirrors LSTM.forward: (logits, (state_h, state_c)).

    input_sequence: (B, T) int32 token ids
    state_h, state_c: (1, B, H) float32
    compute_dtype: matmul-input / gate-stream dtype (bf16 default); accumulation and
    elementwise gate math stay float32, h/c are carried in float32.
    """
    B, T = input_sequence.shape
    H = state_h.shape[-1]
    V, E = params["emb"].shape

    f32 = jnp.float32
    cdt = jnp.dtype(compute_dtype)
    c_item = cdt.itemsize

    # ------- (8,128)-aligned padded geometry -------
    Bp = _round_up(B, 8)
    Ep = _round_up(E, 128)
    Hp = _round_up(H, 128)
    Vp = _round_up(V, 128)   # FC output (lane) padding
    Vr = _round_up(V, 16)    # gate-table rows (16 = bf16 sublane pack)

    # Vocab tile for the FC: multiple of 128 dividing Vp; prefer >=2 grid steps (v7x 2 TCs).
    tn = Vp
    for cand in (512, 256, 128):
        if Vp % cand == 0 and Vp // cand >= 2:
            tn = cand
            break

    # Gate-table row tile: multiple of 16 dividing Vr; prefer >=2 grid steps.
    tv = _row_chunk(Vr, 256, step=16)
    if Vr // tv < 2 and Vr >= 32:
        tv = _row_chunk(Vr, tv // 2, step=16)

    # ------- weight layout / padding (each gate block [i,f,g,o] padded separately) -------
    emb_p = jnp.pad(params["emb"], ((0, Vr - V), (0, Ep - E))).astype(cdt)        # (Vr, Ep)

    wih = jnp.pad(params["w_ih"].reshape(4, H, E), ((0, 0), (0, Hp - H), (0, Ep - E)))
    wih_t = wih.transpose(2, 0, 1).reshape(Ep, 4 * Hp).astype(cdt)                # (Ep, 4Hp)

    whh = jnp.pad(params["w_hh"].reshape(4, H, H), ((0, 0), (0, Hp - H), (0, Hp - H)))
    whh_t = whh.transpose(2, 0, 1).reshape(Hp, 4 * Hp).astype(cdt)                # (Hp, 4Hp)

    b = jnp.pad((params["b_ih"] + params["b_hh"]).reshape(4, H),
                ((0, 0), (0, Hp - H))).reshape(1, 4 * Hp).astype(f32)             # (1, 4Hp)

    wfc_t = jnp.pad(params["w_fc"].T, ((0, Hp - H), (0, Vp - V))).astype(cdt)     # (Hp, Vp)
    bfc = jnp.pad(params["b_fc"], (0, Vp - V)).reshape(1, Vp).astype(f32)         # (1, Vp)

    h0 = jnp.pad(state_h[0], ((0, Bp - B), (0, Hp - H))).astype(f32)              # (Bp, Hp)
    c0 = jnp.pad(state_c[0], ((0, Bp - B), (0, Hp - H))).astype(f32)              # (Bp, Hp)

    # ============ kernel 1: per-vocab gate table  emb @ W_ih^T + b  (parallel over rows) ============
    # TODO(synk): for very large vocabularies with short sequences, stream x@W_ih per token
    # instead of the table (table flops scale with V, not T*B).
    gate_table = pl.pallas_call(
        _gate_table_kernel,
        grid=(Vr // tv,),
        in_specs=[
            pl.BlockSpec((tv, Ep), lambda i: (i, 0)),
            pl.BlockSpec((Ep, 4 * Hp), lambda i: (0, 0)),
            pl.BlockSpec((1, 4 * Hp), lambda i: (0, 0)),
        ],
        out_specs=pl.BlockSpec((tv, 4 * Hp), lambda i: (i, 0)),
        out_shape=jax.ShapeDtypeStruct((Vr, 4 * Hp), cdt),
        compiler_params=pltpu.CompilerParams(
            dimension_semantics=("parallel",),
            vmem_limit_bytes=_vmem_limit(
                tv * Ep * c_item, Ep * 4 * Hp * c_item,
                4 * Hp * 4, tv * 4 * Hp * c_item)),
        cost_estimate=pl.CostEstimate(
            flops=int(2 * Vr * Ep * 4 * Hp),
            transcendentals=0,
            bytes_accessed=int(Vr * Ep * c_item + Ep * 4 * Hp * c_item
                               + Vr * 4 * Hp * c_item)),
    )(emb_p, wih_t, b)

    # ------- per-token gate pre-activations: one row-gather, bf16, time-major -------
    ct_rec = min(32, T)                                  # larger chunk amortizes grid overhead
    T_pad = _round_up(T, ct_rec)
    tok = input_sequence.T.astype(jnp.int32)             # (T, B)
    tok = jnp.pad(tok, ((0, T_pad - T), (0, Bp - B)))    # padded rows -> token 0 (masked later)
    xg = gate_table[tok]                                 # (T_pad, Bp, 4Hp) in compute_dtype

    # ============ kernel 2: serial recurrence (streamed over time-chunks) ============
    rec_kernel = functools.partial(_lstm_recurrence_kernel,
                                   hidden_pad=Hp, chunk=ct_rec, seq_len=T)
    h_fin, c_fin = pl.pallas_call(
        rec_kernel,
        grid=(T_pad // ct_rec,),
        in_specs=[
            pl.BlockSpec((ct_rec, Bp, 4 * Hp), lambda i: (i, 0, 0)),
            pl.BlockSpec((Hp, 4 * Hp), lambda i: (0, 0)),
            pl.BlockSpec((Bp, Hp), lambda i: (0, 0)),
            pl.BlockSpec((Bp, Hp), lambda i: (0, 0)),
        ],
        out_specs=(pl.BlockSpec((Bp, Hp), lambda i: (0, 0)),
                   pl.BlockSpec((Bp, Hp), lambda i: (0, 0))),
        out_shape=(jax.ShapeDtypeStruct((Bp, Hp), f32),
                   jax.ShapeDtypeStruct((Bp, Hp), f32)),
        scratch_shapes=[pltpu.VMEM((Bp, Hp), f32),   # h state, resident across grid
                        pltpu.VMEM((Bp, Hp), f32)],  # c state, resident across grid
        compiler_params=pltpu.CompilerParams(
            dimension_semantics=("arbitrary",),
            vmem_limit_bytes=_vmem_limit(
                ct_rec * Bp * 4 * Hp * c_item, Hp * 4 * Hp * c_item,
                4 * Bp * Hp * 4, 2 * Bp * Hp * 4)),
        cost_estimate=pl.CostEstimate(
            flops=int(2 * T_pad * Bp * Hp * 4 * Hp + 12 * T_pad * Bp * Hp),
            transcendentals=int(5 * T_pad * Bp * Hp),
            bytes_accessed=int(T_pad * Bp * 4 * Hp * c_item + Hp * 4 * Hp * c_item
                               + 6 * Bp * Hp * 4)),
    )(xg, whh_t, h0, c0)

    # ============ kernel 3: final FC, tiled over the vocab dim ============
    logits_pad = pl.pallas_call(
        _fc_kernel,
        grid=(Vp // tn,),
        in_specs=[
            pl.BlockSpec((Bp, Hp), lambda j: (0, 0)),
            pl.BlockSpec((Hp, tn), lambda j: (0, j)),
            pl.BlockSpec((1, tn), lambda j: (0, j)),
        ],
        out_specs=pl.BlockSpec((Bp, tn), lambda j: (0, j)),
        out_shape=jax.ShapeDtypeStruct((Bp, Vp), f32),
        compiler_params=pltpu.CompilerParams(
            dimension_semantics=("parallel",),
            vmem_limit_bytes=_vmem_limit(
                Bp * Hp * 4, Hp * tn * c_item, tn * 4, Bp * tn * 4)),
        cost_estimate=pl.CostEstimate(
            flops=int(2 * Bp * Hp * Vp),
            transcendentals=0,
            bytes_accessed=int(Bp * Hp * 4 + Hp * Vp * c_item + Bp * Vp * 4)),
    )(h_fin, wfc_t, bfc)

    logits = logits_pad[:B, :V]
    h_out = h_fin[:B, :H][None]
    c_out = c_fin[:B, :H][None]
    return logits, (h_out, c_out)


# --------------------------- Reference (pure JAX) --------------------------- #
def lstm_forward_ref(params, input_sequence, state_h, state_c):
    H = state_h.shape[-1]
    x = params["emb"][input_sequence]          # (B, T, E)
    h, c = state_h[0], state_c[0]
    for t in range(x.shape[1]):
        gates = (x[:, t, :] @ params["w_ih"].T + params["b_ih"]
                 + h @ params["w_hh"].T + params["b_hh"])
        i = jax.nn.sigmoid(gates[:, 0 * H:1 * H])
        f = jax.nn.sigmoid(gates[:, 1 * H:2 * H])
        g = jnp.tanh(gates[:, 2 * H:3 * H])
        o = jax.nn.sigmoid(gates[:, 3 * H:4 * H])
        c = f * c + i * g
        h = o * jnp.tanh(c)
    logits = h @ params["w_fc"].T + params["b_fc"]
    return logits, (h[None], c[None])


if __name__ == "__main__":
    # Small, forward-consistent shapes.
    num_embeddings = 128   # vocab size
    embedding_dim = 32
    hidden_size = 32
    batch_size = 2
    seq_len = 8

    key = jax.random.PRNGKey(0)
    k_param, k_tok = jax.random.split(key)
    params = init_params(k_param, num_embeddings, embedding_dim, hidden_size)

    input_sequence = jax.random.randint(k_tok, (batch_size, seq_len), 0,
                                        num_embeddings, dtype=jnp.int32)
    state_h = jnp.zeros((1, batch_size, hidden_size), jnp.float32)
    state_c = jnp.zeros((1, batch_size, hidden_size), jnp.float32)

    fwd = jax.jit(lstm_forward)   # default compute_dtype = bf16 matmul inputs
    logits, (h_out, c_out) = fwd(params, input_sequence, state_h, state_c)
    jax.block_until_ready((logits, h_out, c_out))

    # Sanity check vs pure-JAX f32 reference (bf16 matmul inputs + bf16 gate stream
    # + approx-reciprocal sigmoid => looser tolerances than the f32 path).
    ref_logits, (ref_h, ref_c) = lstm_forward_ref(params, input_sequence, state_h, state_c)
    assert logits.shape == (batch_size, num_embeddings)
    assert h_out.shape == (1, batch_size, hidden_size)
    assert c_out.shape == (1, batch_size, hidden_size)
    assert jnp.allclose(logits, ref_logits, atol=5e-2, rtol=5e-2), "logits mismatch"
    assert jnp.allclose(h_out, ref_h, atol=3e-2, rtol=3e-2), "state_h mismatch"
    assert jnp.allclose(c_out, ref_c, atol=3e-2, rtol=3e-2), "state_c mismatch"

    # TODO(synk): topk_sampling uses host-side Python `random.sample`; not a kernel op.
    print("KERNEL_OK")
</pallas_src>

<mosaic_0001>
module attributes {stable_mosaic.version = 11 : i64} {
  func.func @_gate_table_kernel(%arg0: i32, %arg1: memref<64x128xbf16, #tpu.memory_space<vmem>>, %arg2: memref<128x512xbf16, #tpu.memory_space<vmem>>, %arg3: memref<1x512xf32, #tpu.memory_space<vmem>>, %arg4: memref<64x512xbf16, #tpu.memory_space<vmem>>) attributes {dimension_semantics = [#tpu.dimension_semantics<parallel>], iteration_bounds = array<i64: 2>, scalar_prefetch = 0 : i64, scratch_operands = 0 : i64, tpu.core_type = #tpu.core_type<tc>, window_params = [{transform_indices = @transform_0, window_bounds = array<i64: 64, 128>}, {pipeline_mode = #tpu.pipeline_mode<synchronous>, transform_indices = @transform_1, window_bounds = array<i64: 128, 512>}, {pipeline_mode = #tpu.pipeline_mode<synchronous>, transform_indices = @transform_2, window_bounds = array<i64: 1, 512>}, {transform_indices = @transform_3, window_bounds = array<i64: 64, 512>}]} {
    %c0 = arith.constant 0 : index
    %c0_0 = arith.constant 0 : index
    %0 = vector.load %arg1[%c0, %c0_0] : memref<64x128xbf16, #tpu.memory_space<vmem>>, vector<64x128xbf16>
    %c0_1 = arith.constant 0 : index
    %c0_2 = arith.constant 0 : index
    %1 = vector.load %arg2[%c0_1, %c0_2] : memref<128x512xbf16, #tpu.memory_space<vmem>>, vector<128x512xbf16>
    %cst = arith.constant dense<0.000000e+00> : vector<64x512xf32>
    %2 = tpu.matmul %0, %1, %cst {dimension_numbers = #tpu.dot_dimension_numbers<[1], [0], [0], [1], [0, 0, 1, 1], [], []>} : vector<64x128xbf16>, vector<128x512xbf16>, vector<64x512xf32> -> vector<64x512xf32>
    %c0_3 = arith.constant 0 : index
    %c0_4 = arith.constant 0 : index
    %3 = vector.load %arg3[%c0_3, %c0_4] : memref<1x512xf32, #tpu.memory_space<vmem>>, vector<1x512xf32>
    %4 = vector.broadcast %3 : vector<1x512xf32> to vector<64x512xf32>
    %5 = arith.addf %2, %4 : vector<64x512xf32>
    %6 = arith.truncf %5 : vector<64x512xf32> to vector<64x512xbf16>
    %c0_5 = arith.constant 0 : index
    %c0_6 = arith.constant 0 : index
    %7 = vector.load %arg4[%c0_5, %c0_6] : memref<64x512xbf16, #tpu.memory_space<vmem>>, vector<64x512xbf16>
    tpu.vector_store %arg4[%c0_5, %c0_6], %6 {strides = array<i32>} : memref<64x512xbf16, #tpu.memory_space<vmem>>, vector<64x512xbf16>,
    return
  }
  func.func @transform_0(%arg0: i32) -> (i32, i32) {
    %c0_i32 = arith.constant 0 : i32
    %c0_i32_0 = arith.constant 0 : i32
    return %arg0, %c0_i32 : i32, i32
  }
  func.func @transform_1(%arg0: i32) -> (i32, i32) {
    %c0_i32 = arith.constant 0 : i32
    %c0_i32_0 = arith.constant 0 : i32
    %c0_i32_1 = arith.constant 0 : i32
    return %c0_i32, %c0_i32_0 : i32, i32
  }
  func.func @transform_2(%arg0: i32) -> (i32, i32) {
    %c0_i32 = arith.constant 0 : i32
    %c0_i32_0 = arith.constant 0 : i32
    %c0_i32_1 = arith.constant 0 : i32
    return %c0_i32, %c0_i32_0 : i32, i32
  }
  func.func @transform_3(%arg0: i32) -> (i32, i32) {
    %c0_i32 = arith.constant 0 : i32
    %c0_i32_0 = arith.constant 0 : i32
    return %arg0, %c0_i32 : i32, i32
  }
}

module attributes {stable_mosaic.version = 11 : i64} {
  func.func @_lstm_recurrence_kernel(%arg0: i32, %arg1: memref<8x8x512xbf16, #tpu.memory_space<vmem>>, %arg2: memref<128x512xbf16, #tpu.memory_space<vmem>>, %arg3: memref<8x128xf32, #tpu.memory_space<vmem>>, %arg4: memref<8x128xf32, #tpu.memory_space<vmem>>, %arg5: memref<8x128xf32, #tpu.memory_space<vmem>>, %arg6: memref<8x128xf32, #tpu.memory_space<vmem>>, %arg7: memref<8x128xf32, #tpu.memory_space<vmem>>, %arg8: memref<8x128xf32, #tpu.memory_space<vmem>>) attributes {dimension_semantics = [#tpu.dimension_semantics<arbitrary>], iteration_bounds = array<i64: 1>, scalar_prefetch = 0 : i64, scratch_operands = 2 : i64, tpu.core_type = #tpu.core_type<tc>, window_params = [{transform_indices = @transform_0, window_bounds = array<i64: 8, 8, 512>}, {pipeline_mode = #tpu.pipeline_mode<synchronous>, transform_indices = @transform_1, window_bounds = array<i64: 128, 512>}, {pipeline_mode = #tpu.pipeline_mode<synchronous>, transform_indices = @transform_2, window_bounds = array<i64: 8, 128>}, {pipeline_mode = #tpu.pipeline_mode<synchronous>, transform_indices = @transform_3, window_bounds = array<i64: 8, 128>}, {pipeline_mode = #tpu.pipeline_mode<synchronous>, transform_indices = @transform_4, window_bounds = array<i64: 8, 128>}, {pipeline_mode = #tpu.pipeline_mode<synchronous>, transform_indices = @transform_5, window_bounds = array<i64: 8, 128>}]} {
    %c0_i32 = arith.constant 0 : i32
    %0 = arith.cmpi eq, %arg0, %c0_i32 : i32
    %1 = arith.extui %0 : i1 to i32
    %c0_i32_0 = arith.constant 0 : i32
    %2 = arith.cmpi ne, %1, %c0_i32_0 : i32
    scf.if %2 {
      %c0_84 = arith.constant 0 : index
      %c0_85 = arith.constant 0 : index
      %291 = vector.load %arg3[%c0_84, %c0_85] : memref<8x128xf32, #tpu.memory_space<vmem>>, vector<8x128xf32>
      %c0_86 = arith.constant 0 : index
      %c0_87 = arith.constant 0 : index
      %292 = vector.load %arg7[%c0_86, %c0_87] : memref<8x128xf32, #tpu.memory_space<vmem>>, vector<8x128xf32>
      tpu.vector_store %arg7[%c0_86, %c0_87], %291 {strides = array<i32>} : memref<8x128xf32, #tpu.memory_space<vmem>>, vector<8x128xf32>,
      %c0_88 = arith.constant 0 : index
      %c0_89 = arith.constant 0 : index
      %293 = vector.load %arg4[%c0_88, %c0_89] : memref<8x128xf32, #tpu.memory_space<vmem>>, vector<8x128xf32>
      %c0_90 = arith.constant 0 : index
      %c0_91 = arith.constant 0 : index
      %294 = vector.load %arg8[%c0_90, %c0_91] : memref<8x128xf32, #tpu.memory_space<vmem>>, vector<8x128xf32>
      tpu.vector_store %arg8[%c0_90, %c0_91], %293 {strides = array<i32>} : memref<8x128xf32, #tpu.memory_space<vmem>>, vector<8x128xf32>,
    } else {
    }
    %c0 = arith.constant 0 : index
    %c0_1 = arith.constant 0 : index
    %3 = vector.load %arg2[%c0, %c0_1] : memref<128x512xbf16, #tpu.memory_space<vmem>>, vector<128x512xbf16>
    %c0_2 = arith.constant 0 : index
    %c0_3 = arith.constant 0 : index
    %4 = vector.load %arg7[%c0_2, %c0_3] : memref<8x128xf32, #tpu.memory_space<vmem>>, vector<8x128xf32>
    %c0_4 = arith.constant 0 : index
    %c0_5 = arith.constant 0 : index
    %5 = vector.load %arg8[%c0_4, %c0_5] : memref<8x128xf32, #tpu.memory_space<vmem>>, vector<8x128xf32>
    %c0_i32_6 = arith.constant 0 : i32
    %6 = arith.index_cast %c0_i32_6 : i32 to index
    %c0_7 = arith.constant 0 : index
    %c0_8 = arith.constant 0 : index
    %7 = vector.load %arg1[%6, %c0_7, %c0_8] : memref<8x8x512xbf16, #tpu.memory_space<vmem>>, vector<1x8x512xbf16>
    %8 = vector.shape_cast %7 : vector<1x8x512xbf16> to vector<8x512xbf16>
    %9 = arith.extf %8 : vector<8x512xbf16> to vector<8x512xf32>
    %10 = arith.truncf %4 : vector<8x128xf32> to vector<8x128xbf16>
    %cst = arith.constant dense<0.000000e+00> : vector<8x512xf32>
    %11 = tpu.matmul %10, %3, %cst {dimension_numbers = #tpu.dot_dimension_numbers<[1], [0], [0], [1], [0, 0, 1, 1], [], []>} : vector<8x128xbf16>, vector<128x512xbf16>, vector<8x512xf32> -> vector<8x512xf32>
    %12 = arith.addf %9, %11 : vector<8x512xf32>
    %13 = vector.extract_strided_slice %12 {offsets = [0, 0], sizes = [8, 128], strides = [1, 1]} : vector<8x512xf32> to vector<8x128xf32>
    %cst_9 = arith.constant 0.000000e+00 : f32
    %14 = vector.broadcast %cst_9 : f32 to vector<8x128xf32>
    %15 = arith.subf %14, %13 : vector<8x128xf32>
    %16 = math.exp %15 : vector<8x128xf32>
    %cst_10 = arith.constant 1.000000e+00 : f32
    %17 = vector.broadcast %cst_10 : f32 to vector<8x128xf32>
    %18 = arith.addf %17, %16 : vector<8x128xf32>
    %19 = tpu.reciprocal %18 {approx = true} : vector<8x128xf32> -> vector<8x128xf32>
    %20 = vector.extract_strided_slice %12 {offsets = [0, 128], sizes = [8, 128], strides = [1, 1]} : vector<8x512xf32> to vector<8x128xf32>
    %cst_11 = arith.constant 0.000000e+00 : f32
    %21 = vector.broadcast %cst_11 : f32 to vector<8x128xf32>
    %22 = arith.subf %21, %20 : vector<8x128xf32>
    %23 = math.exp %22 : vector<8x128xf32>
    %cst_12 = arith.constant 1.000000e+00 : f32
    %24 = vector.broadcast %cst_12 : f32 to vector<8x128xf32>
    %25 = arith.addf %24, %23 : vector<8x128xf32>
    %26 = tpu.reciprocal %25 {approx = true} : vector<8x128xf32> -> vector<8x128xf32>
    %27 = vector.extract_strided_slice %12 {offsets = [0, 256], sizes = [8, 128], strides = [1, 1]} : vector<8x512xf32> to vector<8x128xf32>
    %28 = math.tanh %27 : vector<8x128xf32>
    %29 = vector.extract_strided_slice %12 {offsets = [0, 384], sizes = [8, 128], strides = [1, 1]} : vector<8x512xf32> to vector<8x128xf32>
    %cst_13 = arith.constant 0.000000e+00 : f32
    %30 = vector.broadcast %cst_13 : f32 to vector<8x128xf32>
    %31 = arith.subf %30, %29 : vector<8x128xf32>
    %32 = math.exp %31 : vector<8x128xf32>
    %cst_14 = arith.constant 1.000000e+00 : f32
    %33 = vector.broadcast %cst_14 : f32 to vector<8x128xf32>
    %34 = arith.addf %33, %32 : vector<8x128xf32>
    %35 = tpu.reciprocal %34 {approx = true} : vector<8x128xf32> -> vector<8x128xf32>
    %36 = arith.mulf %26, %5 : vector<8x128xf32>
    %37 = arith.mulf %19, %28 : vector<8x128xf32>
    %38 = arith.addf %36, %37 : vector<8x128xf32>
    %39 = math.tanh %38 : vector<8x128xf32>
    %40 = arith.mulf %35, %39 : vector<8x128xf32>
    %c1_i32 = arith.constant 1 : i32
    %41 = arith.index_cast %c1_i32 : i32 to index
    %c0_15 = arith.constant 0 : index
    %c0_16 = arith.constant 0 : index
    %42 = vector.load %arg1[%41, %c0_15, %c0_16] : memref<8x8x512xbf16, #tpu.memory_space<vmem>>, vector<1x8x512xbf16>
    %43 = vector.shape_cast %42 : vector<1x8x512xbf16> to vector<8x512xbf16>
    %44 = arith.extf %43 : vector<8x512xbf16> to vector<8x512xf32>
    %45 = arith.truncf %40 : vector<8x128xf32> to vector<8x128xbf16>
    %cst_17 = arith.constant dense<0.000000e+00> : vector<8x512xf32>
    %46 = tpu.matmul %45, %3, %cst_17 {dimension_numbers = #tpu.dot_dimension_numbers<[1], [0], [0], [1], [0, 0, 1, 1], [], []>} : vector<8x128xbf16>, vector<128x512xbf16>, vector<8x512xf32> -> vector<8x512xf32>
    %47 = arith.addf %44, %46 : vector<8x512xf32>
    %48 = vector.extract_strided_slice %47 {offsets = [0, 0], sizes = [8, 128], strides = [1, 1]} : vector<8x512xf32> to vector<8x128xf32>
    %cst_18 = arith.constant 0.000000e+00 : f32
    %49 = vector.broadcast %cst_18 : f32 to vector<8x128xf32>
    %50 = arith.subf %49, %48 : vector<8x128xf32>
    %51 = math.exp %50 : vector<8x128xf32>
    %cst_19 = arith.constant 1.000000e+00 : f32
    %52 = vector.broadcast %cst_19 : f32 to vector<8x128xf32>
    %53 = arith.addf %52, %51 : vector<8x128xf32>
    %54 = tpu.reciprocal %53 {approx = true} : vector<8x128xf32> -> vector<8x128xf32>
    %55 = vector.extract_strided_slice %47 {offsets = [0, 128], sizes = [8, 128], strides = [1, 1]} : vector<8x512xf32> to vector<8x128xf32>
    %cst_20 = arith.constant 0.000000e+00 : f32
    %56 = vector.broadcast %cst_20 : f32 to vector<8x128xf32>
    %57 = arith.subf %56, %55 : vector<8x128xf32>
    %58 = math.exp %57 : vector<8x128xf32>
    %cst_21 = arith.constant 1.000000e+00 : f32
    %59 = vector.broadcast %cst_21 : f32 to vector<8x128xf32>
    %60 = arith.addf %59, %58 : vector<8x128xf32>
    %61 = tpu.reciprocal %60 {approx = true} : vector<8x128xf32> -> vector<8x128xf32>
    %62 = vector.extract_strided_slice %47 {offsets = [0, 256], sizes = [8, 128], strides = [1, 1]} : vector<8x512xf32> to vector<8x128xf32>
    %63 = math.tanh %62 : vector<8x128xf32>
    %64 = vector.extract_strided_slice %47 {offsets = [0, 384], sizes = [8, 128], strides = [1, 1]} : vector<8x512xf32> to vector<8x128xf32>
    %cst_22 = arith.constant 0.000000e+00 : f32
    %65 = vector.broadcast %cst_22 : f32 to vector<8x128xf32>
    %66 = arith.subf %65, %64 : vector<8x128xf32>
    %67 = math.exp %66 : vector<8x128xf32>
    %cst_23 = arith.constant 1.000000e+00 : f32
    %68 = vector.broadcast %cst_23 : f32 to vector<8x128xf32>
    %69 = arith.addf %68, %67 : vector<8x128xf32>
    %70 = tpu.reciprocal %69 {approx = true} : vector<8x128xf32> -> vector<8x128xf32>
    %71 = arith.mulf %61, %38 : vector<8x128xf32>
    %72 = arith.mulf %54, %63 : vector<8x128xf32>
    %73 = arith.addf %71, %72 : vector<8x128xf32>
    %74 = math.tanh %73 : vector<8x128xf32>
    %75 = arith.mulf %70, %74 : vector<8x128xf32>
    %c2_i32 = arith.constant 2 : i32
    %76 = arith.index_cast %c2_i32 : i32 to index
    %c0_24 = arith.constant 0 : index
    %c0_25 = arith.constant 0 : index
    %77 = vector.load %arg1[%76, %c0_24, %c0_25] : memref<8x8x512xbf16, #tpu.memory_space<vmem>>, vector<1x8x512xbf16>
    %78 = vector.shape_cast %77 : vector<1x8x512xbf16> to vector<8x512xbf16>
    %79 = arith.extf %78 : vector<8x512xbf16> to vector<8x512xf32>
    %80 = arith.truncf %75 : vector<8x128xf32> to vector<8x128xbf16>
    %cst_26 = arith.constant dense<0.000000e+00> : vector<8x512xf32>
    %81 = tpu.matmul %80, %3, %cst_26 {dimension_numbers = #tpu.dot_dimension_numbers<[1], [0], [0], [1], [0, 0, 1, 1], [], []>} : vector<8x128xbf16>, vector<128x512xbf16>, vector<8x512xf32> -> vector<8x512xf32>
    %82 = arith.addf %79, %81 : vector<8x512xf32>
    %83 = vector.extract_strided_slice %82 {offsets = [0, 0], sizes = [8, 128], strides = [1, 1]} : vector<8x512xf32> to vector<8x128xf32>
    %cst_27 = arith.constant 0.000000e+00 : f32
    %84 = vector.broadcast %cst_27 : f32 to vector<8x128xf32>
    %85 = arith.subf %84, %83 : vector<8x128xf32>
    %86 = math.exp %85 : vector<8x128xf32>
    %cst_28 = arith.constant 1.000000e+00 : f32
    %87 = vector.broadcast %cst_28 : f32 to vector<8x128xf32>
    %88 = arith.addf %87, %86 : vector<8x128xf32>
    %89 = tpu.reciprocal %88 {approx = true} : vector<8x128xf32> -> vector<8x128xf32>
    %90 = vector.extract_strided_slice %82 {offsets = [0, 128], sizes = [8, 128], strides = [1, 1]} : vector<8x512xf32> to vector<8x128xf32>
    %cst_29 = arith.constant 0.000000e+00 : f32
    %91 = vector.broadcast %cst_29 : f32 to vector<8x128xf32>
    %92 = arith.subf %91, %90 : vector<8x128xf32>
    %93 = math.exp %92 : vector<8x128xf32>
    %cst_30 = arith.constant 1.000000e+00 : f32
    %94 = vector.broadcast %cst_30 : f32 to vector<8x128xf32>
    %95 = arith.addf %94, %93 : vector<8x128xf32>
    %96 = tpu.reciprocal %95 {approx = true} : vector<8x128xf32> -> vector<8x128xf32>
    %97 = vector.extract_strided_slice %82 {offsets = [0, 256], sizes = [8, 128], strides = [1, 1]} : vector<8x512xf32> to vector<8x128xf32>
    %98 = math.tanh %97 : vector<8x128xf32>
    %99 = vector.extract_strided_slice %82 {offsets = [0, 384], sizes = [8, 128], strides = [1, 1]} : vector<8x512xf32> to vector<8x128xf32>
    %cst_31 = arith.constant 0.000000e+00 : f32
    %100 = vector.broadcast %cst_31 : f32 to vector<8x128xf32>
    %101 = arith.subf %100, %99 : vector<8x128xf32>
    %102 = math.exp %101 : vector<8x128xf32>
    %cst_32 = arith.constant 1.000000e+00 : f32
    %103 = vector.broadcast %cst_32 : f32 to vector<8x128xf32>
    %104 = arith.addf %103, %102 : vector<8x128xf32>
    %105 = tpu.reciprocal %104 {approx = true} : vector<8x128xf32> -> vector<8x128xf32>
    %106 = arith.mulf %96, %73 : vector<8x128xf32>
    %107 = arith.mulf %89, %98 : vector<8x128xf32>
    %108 = arith.addf %106, %107 : vector<8x128xf32>
    %109 = math.tanh %108 : vector<8x128xf32>
    %110 = arith.mulf %105, %109 : vector<8x128xf32>
    %c3_i32 = arith.constant 3 : i32
    %111 = arith.index_cast %c3_i32 : i32 to index
    %c0_33 = arith.constant 0 : index
    %c0_34 = arith.constant 0 : index
    %112 = vector.load %arg1[%111, %c0_33, %c0_34] : memref<8x8x512xbf16, #tpu.memory_space<vmem>>, vector<1x8x512xbf16>
    %113 = vector.shape_cast %112 : vector<1x8x512xbf16> to vector<8x512xbf16>
    %114 = arith.extf %113 : vector<8x512xbf16> to vector<8x512xf32>
    %115 = arith.truncf %110 : vector<8x128xf32> to vector<8x128xbf16>
    %cst_35 = arith.constant dense<0.000000e+00> : vector<8x512xf32>
    %116 = tpu.matmul %115, %3, %cst_35 {dimension_numbers = #tpu.dot_dimension_numbers<[1], [0], [0], [1], [0, 0, 1, 1], [], []>} : vector<8x128xbf16>, vector<128x512xbf16>, vector<8x512xf32> -> vector<8x512xf32>
    %117 = arith.addf %114, %116 : vector<8x512xf32>
    %118 = vector.extract_strided_slice %117 {offsets = [0, 0], sizes = [8, 128], strides = [1, 1]} : vector<8x512xf32> to vector<8x128xf32>
    %cst_36 = arith.constant 0.000000e+00 : f32
    %119 = vector.broadcast %cst_36 : f32 to vector<8x128xf32>
    %120 = arith.subf %119, %118 : vector<8x128xf32>
    %121 = math.exp %120 : vector<8x128xf32>
    %cst_37 = arith.constant 1.000000e+00 : f32
    %122 = vector.broadcast %cst_37 : f32 to vector<8x128xf32>
    %123 = arith.addf %122, %121 : vector<8x128xf32>
    %124 = tpu.reciprocal %123 {approx = true} : vector<8x128xf32> -> vector<8x128xf32>
    %125 = vector.extract_strided_slice %117 {offsets = [0, 128], sizes = [8, 128], strides = [1, 1]} : vector<8x512xf32> to vector<8x128xf32>
    %cst_38 = arith.constant 0.000000e+00 : f32
    %126 = vector.broadcast %cst_38 : f32 to vector<8x128xf32>
    %127 = arith.subf %126, %125 : vector<8x128xf32>
    %128 = math.exp %127 : vector<8x128xf32>
    %cst_39 = arith.constant 1.000000e+00 : f32
    %129 = vector.broadcast %cst_39 : f32 to vector<8x128xf32>
    %130 = arith.addf %129, %128 : vector<8x128xf32>
    %131 = tpu.reciprocal %130 {approx = true} : vector<8x128xf32> -> vector<8x128xf32>
    %132 = vector.extract_strided_slice %117 {offsets = [0, 256], sizes = [8, 128], strides = [1, 1]} : vector<8x512xf32> to vector<8x128xf32>
    %133 = math.tanh %132 : vector<8x128xf32>
    %134 = vector.extract_strided_slice %117 {offsets = [0, 384], sizes = [8, 128], strides = [1, 1]} : vector<8x512xf32> to vector<8x128xf32>
    %cst_40 = arith.constant 0.000000e+00 : f32
    %135 = vector.broadcast %cst_40 : f32 to vector<8x128xf32>
    %136 = arith.subf %135, %134 : vector<8x128xf32>
    %137 = math.exp %136 : vector<8x128xf32>
    %cst_41 = arith.constant 1.000000e+00 : f32
    %138 = vector.broadcast %cst_41 : f32 to vector<8x128xf32>
    %139 = arith.addf %138, %137 : vector<8x128xf32>
    %140 = tpu.reciprocal %139 {approx = true} : vector<8x128xf32> -> vector<8x128xf32>
    %141 = arith.mulf %131, %108 : vector<8x128xf32>
    %142 = arith.mulf %124, %133 : vector<8x128xf32>
    %143 = arith.addf %141, %142 : vector<8x128xf32>
    %144 = math.tanh %143 : vector<8x128xf32>
    %145 = arith.mulf %140, %144 : vector<8x128xf32>
    %c4_i32 = arith.constant 4 : i32
    %146 = arith.index_cast %c4_i32 : i32 to index
    %c0_42 = arith.constant 0 : index
    %c0_43 = arith.constant 0 : index
    %147 = vector.load %arg1[%146, %c0_42, %c0_43] : memref<8x8x512xbf16, #tpu.memory_space<vmem>>, vector<1x8x512xbf16>
    %148 = vector.shape_cast %147 : vector<1x8x512xbf16> to vector<8x512xbf16>
    %149 = arith.extf %148 : vector<8x512xbf16> to vector<8x512xf32>
    %150 = arith.truncf %145 : vector<8x128xf32> to vector<8x128xbf16>
    %cst_44 = arith.constant dense<0.000000e+00> : vector<8x512xf32>
    %151 = tpu.matmul %150, %3, %cst_44 {dimension_numbers = #tpu.dot_dimension_numbers<[1], [0], [0], [1], [0, 0, 1, 1], [], []>} : vector<8x128xbf16>, vector<128x512xbf16>, vector<8x512xf32> -> vector<8x512xf32>
    %152 = arith.addf %149, %151 : vector<8x512xf32>
    %153 = vector.extract_strided_slice %152 {offsets = [0, 0], sizes = [8, 128], strides = [1, 1]} : vector<8x512xf32> to vector<8x128xf32>
    %cst_45 = arith.constant 0.000000e+00 : f32
    %154 = vector.broadcast %cst_45 : f32 to vector<8x128xf32>
    %155 = arith.subf %154, %153 : vector<8x128xf32>
    %156 = math.exp %155 : vector<8x128xf32>
    %cst_46 = arith.constant 1.000000e+00 : f32
    %157 = vector.broadcast %cst_46 : f32 to vector<8x128xf32>
    %158 = arith.addf %157, %156 : vector<8x128xf32>
    %159 = tpu.reciprocal %158 {approx = true} : vector<8x128xf32> -> vector<8x128xf32>
    %160 = vector.extract_strided_slice %152 {offsets = [0, 128], sizes = [8, 128], strides = [1, 1]} : vector<8x512xf32> to vector<8x128xf32>
    %cst_47 = arith.constant 0.000000e+00 : f32
    %161 = vector.broadcast %cst_47 : f32 to vector<8x128xf32>
    %162 = arith.subf %161, %160 : vector<8x128xf32>
    %163 = math.exp %162 : vector<8x128xf32>
    %cst_48 = arith.constant 1.000000e+00 : f32
    %164 = vector.broadcast %cst_48 : f32 to vector<8x128xf32>
    %165 = arith.addf %164, %163 : vector<8x128xf32>
    %166 = tpu.reciprocal %165 {approx = true} : vector<8x128xf32> -> vector<8x128xf32>
    %167 = vector.extract_strided_slice %152 {offsets = [0, 256], sizes = [8, 128], strides = [1, 1]} : vector<8x512xf32> to vector<8x128xf32>
    %168 = math.tanh %167 : vector<8x128xf32>
    %169 = vector.extract_strided_slice %152 {offsets = [0, 384], sizes = [8, 128], strides = [1, 1]} : vector<8x512xf32> to vector<8x128xf32>
    %cst_49 = arith.constant 0.000000e+00 : f32
    %170 = vector.broadcast %cst_49 : f32 to vector<8x128xf32>
    %171 = arith.subf %170, %169 : vector<8x128xf32>
    %172 = math.exp %171 : vector<8x128xf32>
    %cst_50 = arith.constant 1.000000e+00 : f32
    %173 = vector.broadcast %cst_50 : f32 to vector<8x128xf32>
    %174 = arith.addf %173, %172 : vector<8x128xf32>
    %175 = tpu.reciprocal %174 {approx = true} : vector<8x128xf32> -> vector<8x128xf32>
    %176 = arith.mulf %166, %143 : vector<8x128xf32>
    %177 = arith.mulf %159, %168 : vector<8x128xf32>
    %178 = arith.addf %176, %177 : vector<8x128xf32>
    %179 = math.tanh %178 : vector<8x128xf32>
    %180 = arith.mulf %175, %179 : vector<8x128xf32>
    %c5_i32 = arith.constant 5 : i32
    %181 = arith.index_cast %c5_i32 : i32 to index
    %c0_51 = arith.constant 0 : index
    %c0_52 = arith.constant 0 : index
    %182 = vector.load %arg1[%181, %c0_51, %c0_52] : memref<8x8x512xbf16, #tpu.memory_space<vmem>>, vector<1x8x512xbf16>
    %183 = vector.shape_cast %182 : vector<1x8x512xbf16> to vector<8x512xbf16>
    %184 = arith.extf %183 : vector<8x512xbf16> to vector<8x512xf32>
    %185 = arith.truncf %180 : vector<8x128xf32> to vector<8x128xbf16>
    %cst_53 = arith.constant dense<0.000000e+00> : vector<8x512xf32>
    %186 = tpu.matmul %185, %3, %cst_53 {dimension_numbers = #tpu.dot_dimension_numbers<[1], [0], [0], [1], [0, 0, 1, 1], [], []>} : vector<8x128xbf16>, vector<128x512xbf16>, vector<8x512xf32> -> vector<8x512xf32>
    %187 = arith.addf %184, %186 : vector<8x512xf32>
    %188 = vector.extract_strided_slice %187 {offsets = [0, 0], sizes = [8, 128], strides = [1, 1]} : vector<8x512xf32> to vector<8x128xf32>
    %cst_54 = arith.constant 0.000000e+00 : f32
    %189 = vector.broadcast %cst_54 : f32 to vector<8x128xf32>
    %190 = arith.subf %189, %188 : vector<8x128xf32>
    %191 = math.exp %190 : vector<8x128xf32>
    %cst_55 = arith.constant 1.000000e+00 : f32
    %192 = vector.broadcast %cst_55 : f32 to vector<8x128xf32>
    %193 = arith.addf %192, %191 : vector<8x128xf32>
    %194 = tpu.reciprocal %193 {approx = true} : vector<8x128xf32> -> vector<8x128xf32>
    %195 = vector.extract_strided_slice %187 {offsets = [0, 128], sizes = [8, 128], strides = [1, 1]} : vector<8x512xf32> to vector<8x128xf32>
    %cst_56 = arith.constant 0.000000e+00 : f32
    %196 = vector.broadcast %cst_56 : f32 to vector<8x128xf32>
    %197 = arith.subf %196, %195 : vector<8x128xf32>
    %198 = math.exp %197 : vector<8x128xf32>
    %cst_57 = arith.constant 1.000000e+00 : f32
    %199 = vector.broadcast %cst_57 : f32 to vector<8x128xf32>
    %200 = arith.addf %199, %198 : vector<8x128xf32>
    %201 = tpu.reciprocal %200 {approx = true} : vector<8x128xf32> -> vector<8x128xf32>
    %202 = vector.extract_strided_slice %187 {offsets = [0, 256], sizes = [8, 128], strides = [1, 1]} : vector<8x512xf32> to vector<8x128xf32>
    %203 = math.tanh %202 : vector<8x128xf32>
    %204 = vector.extract_strided_slice %187 {offsets = [0, 384], sizes = [8, 128], strides = [1, 1]} : vector<8x512xf32> to vector<8x128xf32>
    %cst_58 = arith.constant 0.000000e+00 : f32
    %205 = vector.broadcast %cst_58 : f32 to vector<8x128xf32>
    %206 = arith.subf %205, %204 : vector<8x128xf32>
    %207 = math.exp %206 : vector<8x128xf32>
    %cst_59 = arith.constant 1.000000e+00 : f32
    %208 = vector.broadcast %cst_59 : f32 to vector<8x128xf32>
    %209 = arith.addf %208, %207 : vector<8x128xf32>
    %210 = tpu.reciprocal %209 {approx = true} : vector<8x128xf32> -> vector<8x128xf32>
    %211 = arith.mulf %201, %178 : vector<8x128xf32>
    %212 = arith.mulf %194, %203 : vector<8x128xf32>
    %213 = arith.addf %211, %212 : vector<8x128xf32>
    %214 = math.tanh %213 : vector<8x128xf32>
    %215 = arith.mulf %210, %214 : vector<8x128xf32>
    %c6_i32 = arith.constant 6 : i32
    %216 = arith.index_cast %c6_i32 : i32 to index
    %c0_60 = arith.constant 0 : index
    %c0_61 = arith.constant 0 : index
    %217 = vector.load %arg1[%216, %c0_60, %c0_61] : memref<8x8x512xbf16, #tpu.memory_space<vmem>>, vector<1x8x512xbf16>
    %218 = vector.shape_cast %217 : vector<1x8x512xbf16> to vector<8x512xbf16>
    %219 = arith.extf %218 : vector<8x512xbf16> to vector<8x512xf32>
    %220 = arith.truncf %215 : vector<8x128xf32> to vector<8x128xbf16>
    %cst_62 = arith.constant dense<0.000000e+00> : vector<8x512xf32>
    %221 = tpu.matmul %220, %3, %cst_62 {dimension_numbers = #tpu.dot_dimension_numbers<[1], [0], [0], [1], [0, 0, 1, 1], [], []>} : vector<8x128xbf16>, vector<128x512xbf16>, vector<8x512xf32> -> vector<8x512xf32>
    %222 = arith.addf %219, %221 : vector<8x512xf32>
    %223 = vector.extract_strided_slice %222 {offsets = [0, 0], sizes = [8, 128], strides = [1, 1]} : vector<8x512xf32> to vector<8x128xf32>
    %cst_63 = arith.constant 0.000000e+00 : f32
    %224 = vector.broadcast %cst_63 : f32 to vector<8x128xf32>
    %225 = arith.subf %224, %223 : vector<8x128xf32>
    %226 = math.exp %225 : vector<8x128xf32>
    %cst_64 = arith.constant 1.000000e+00 : f32
    %227 = vector.broadcast %cst_64 : f32 to vector<8x128xf32>
    %228 = arith.addf %227, %226 : vector<8x128xf32>
    %229 = tpu.reciprocal %228 {approx = true} : vector<8x128xf32> -> vector<8x128xf32>
    %230 = vector.extract_strided_slice %222 {offsets = [0, 128], sizes = [8, 128], strides = [1, 1]} : vector<8x512xf32> to vector<8x128xf32>
    %cst_65 = arith.constant 0.000000e+00 : f32
    %231 = vector.broadcast %cst_65 : f32 to vector<8x128xf32>
    %232 = arith.subf %231, %230 : vector<8x128xf32>
    %233 = math.exp %232 : vector<8x128xf32>
    %cst_66 = arith.constant 1.000000e+00 : f32
    %234 = vector.broadcast %cst_66 : f32 to vector<8x128xf32>
    %235 = arith.addf %234, %233 : vector<8x128xf32>
    %236 = tpu.reciprocal %235 {approx = true} : vector<8x128xf32> -> vector<8x128xf32>
    %237 = vector.extract_strided_slice %222 {offsets = [0, 256], sizes = [8, 128], strides = [1, 1]} : vector<8x512xf32> to vector<8x128xf32>
    %238 = math.tanh %237 : vector<8x128xf32>
    %239 = vector.extract_strided_slice %222 {offsets = [0, 384], sizes = [8, 128], strides = [1, 1]} : vector<8x512xf32> to vector<8x128xf32>
    %cst_67 = arith.constant 0.000000e+00 : f32
    %240 = vector.broadcast %cst_67 : f32 to vector<8x128xf32>
    %241 = arith.subf %240, %239 : vector<8x128xf32>
    %242 = math.exp %241 : vector<8x128xf32>
    %cst_68 = arith.constant 1.000000e+00 : f32
    %243 = vector.broadcast %cst_68 : f32 to vector<8x128xf32>
    %244 = arith.addf %243, %242 : vector<8x128xf32>
    %245 = tpu.reciprocal %244 {approx = true} : vector<8x128xf32> -> vector<8x128xf32>
    %246 = arith.mulf %236, %213 : vector<8x128xf32>
    %247 = arith.mulf %229, %238 : vector<8x128xf32>
    %248 = arith.addf %246, %247 : vector<8x128xf32>
    %249 = math.tanh %248 : vector<8x128xf32>
    %250 = arith.mulf %245, %249 : vector<8x128xf32>
    %c7_i32 = arith.constant 7 : i32
    %251 = arith.index_cast %c7_i32 : i32 to index
    %c0_69 = arith.constant 0 : index
    %c0_70 = arith.constant 0 : index
    %252 = vector.load %arg1[%251, %c0_69, %c0_70] : memref<8x8x512xbf16, #tpu.memory_space<vmem>>, vector<1x8x512xbf16>
    %253 = vector.shape_cast %252 : vector<1x8x512xbf16> to vector<8x512xbf16>
    %254 = arith.extf %253 : vector<8x512xbf16> to vector<8x512xf32>
    %255 = arith.truncf %250 : vector<8x128xf32> to vector<8x128xbf16>
    %cst_71 = arith.constant dense<0.000000e+00> : vector<8x512xf32>
    %256 = tpu.matmul %255, %3, %cst_71 {dimension_numbers = #tpu.dot_dimension_numbers<[1], [0], [0], [1], [0, 0, 1, 1], [], []>} : vector<8x128xbf16>, vector<128x512xbf16>, vector<8x512xf32> -> vector<8x512xf32>
    %257 = arith.addf %254, %256 : vector<8x512xf32>
    %258 = vector.extract_strided_slice %257 {offsets = [0, 0], sizes = [8, 128], strides = [1, 1]} : vector<8x512xf32> to vector<8x128xf32>
    %cst_72 = arith.constant 0.000000e+00 : f32
    %259 = vector.broadcast %cst_72 : f32 to vector<8x128xf32>
    %260 = arith.subf %259, %258 : vector<8x128xf32>
    %261 = math.exp %260 : vector<8x128xf32>
    %cst_73 = arith.constant 1.000000e+00 : f32
    %262 = vector.broadcast %cst_73 : f32 to vector<8x128xf32>
    %263 = arith.addf %262, %261 : vector<8x128xf32>
    %264 = tpu.reciprocal %263 {approx = true} : vector<8x128xf32> -> vector<8x128xf32>
    %265 = vector.extract_strided_slice %257 {offsets = [0, 128], sizes = [8, 128], strides = [1, 1]} : vector<8x512xf32> to vector<8x128xf32>
    %cst_74 = arith.constant 0.000000e+00 : f32
    %266 = vector.broadcast %cst_74 : f32 to vector<8x128xf32>
    %267 = arith.subf %266, %265 : vector<8x128xf32>
    %268 = math.exp %267 : vector<8x128xf32>
    %cst_75 = arith.constant 1.000000e+00 : f32
    %269 = vector.broadcast %cst_75 : f32 to vector<8x128xf32>
    %270 = arith.addf %269, %268 : vector<8x128xf32>
    %271 = tpu.reciprocal %270 {approx = true} : vector<8x128xf32> -> vector<8x128xf32>
    %272 = vector.extract_strided_slice %257 {offsets = [0, 256], sizes = [8, 128], strides = [1, 1]} : vector<8x512xf32> to vector<8x128xf32>
    %273 = math.tanh %272 : vector<8x128xf32>
    %274 = vector.extract_strided_slice %257 {offsets = [0, 384], sizes = [8, 128], strides = [1, 1]} : vector<8x512xf32> to vector<8x128xf32>
    %cst_76 = arith.constant 0.000000e+00 : f32
    %275 = vector.broadcast %cst_76 : f32 to vector<8x128xf32>
    %276 = arith.subf %275, %274 : vector<8x128xf32>
    %277 = math.exp %276 : vector<8x128xf32>
    %cst_77 = arith.constant 1.000000e+00 : f32
    %278 = vector.broadcast %cst_77 : f32 to vector<8x128xf32>
    %279 = arith.addf %278, %277 : vector<8x128xf32>
    %280 = tpu.reciprocal %279 {approx = true} : vector<8x128xf32> -> vector<8x128xf32>
    %281 = arith.mulf %271, %248 : vector<8x128xf32>
    %282 = arith.mulf %264, %273 : vector<8x128xf32>
    %283 = arith.addf %281, %282 : vector<8x128xf32>
    %284 = math.tanh %283 : vector<8x128xf32>
    %285 = arith.mulf %280, %284 : vector<8x128xf32>
    %c8_i32 = arith.constant 8 : i32
    %c0_78 = arith.constant 0 : index
    %c0_79 = arith.constant 0 : index
    %286 = vector.load %arg7[%c0_78, %c0_79] : memref<8x128xf32, #tpu.memory_space<vmem>>, vector<8x128xf32>
    tpu.vector_store %arg7[%c0_78, %c0_79], %285 {strides = array<i32>} : memref<8x128xf32, #tpu.memory_space<vmem>>, vector<8x128xf32>,
    %c0_80 = arith.constant 0 : index
    %c0_81 = arith.constant 0 : index
    %287 = vector.load %arg8[%c0_80, %c0_81] : memref<8x128xf32, #tpu.memory_space<vmem>>, vector<8x128xf32>
    tpu.vector_store %arg8[%c0_80, %c0_81], %283 {strides = array<i32>} : memref<8x128xf32, #tpu.memory_space<vmem>>, vector<8x128xf32>,
    %c0_i32_82 = arith.constant 0 : i32
    %288 = arith.cmpi eq, %arg0, %c0_i32_82 : i32
    %289 = arith.extui %288 : i1 to i32
    %c0_i32_83 = arith.constant 0 : i32
    %290 = arith.cmpi ne, %289, %c0_i32_83 : i32
    scf.if %290 {
      %c0_84 = arith.constant 0 : index
      %c0_85 = arith.constant 0 : index
      %291 = vector.load %arg7[%c0_84, %c0_85] : memref<8x128xf32, #tpu.memory_space<vmem>>, vector<8x128xf32>
      %c0_86 = arith.constant 0 : index
      %c0_87 = arith.constant 0 : index
      %292 = vector.load %arg5[%c0_86, %c0_87] : memref<8x128xf32, #tpu.memory_space<vmem>>, vector<8x128xf32>
      tpu.vector_store %arg5[%c0_86, %c0_87], %291 {strides = array<i32>} : memref<8x128xf32, #tpu.memory_space<vmem>>, vector<8x128xf32>,
      %c0_88 = arith.constant 0 : index
      %c0_89 = arith.constant 0 : index
      %293 = vector.load %arg8[%c0_88, %c0_89] : memref<8x128xf32, #tpu.memory_space<vmem>>, vector<8x128xf32>
      %c0_90 = arith.constant 0 : index
      %c0_91 = arith.constant 0 : index
      %294 = vector.load %arg6[%c0_90, %c0_91] : memref<8x128xf32, #tpu.memory_space<vmem>>, vector<8x128xf32>
      tpu.vector_store %arg6[%c0_90, %c0_91], %293 {strides = array<i32>} : memref<8x128xf32, #tpu.memory_space<vmem>>, vector<8x128xf32>,
    } else {
    }
    return
  }
  func.func @transform_0(%arg0: i32) -> (i32, i32, i32) {
    %c0_i32 = arith.constant 0 : i32
    %c0_i32_0 = arith.constant 0 : i32
    %c0_i32_1 = arith.constant 0 : i32
    return %arg0, %c0_i32, %c0_i32_0 : i32, i32, i32
  }
  func.func @transform_1(%arg0: i32) -> (i32, i32) {
    %c0_i32 = arith.constant 0 : i32
    %c0_i32_0 = arith.constant 0 : i32
    %c0_i32_1 = arith.constant 0 : i32
    return %c0_i32, %c0_i32_0 : i32, i32
  }
  func.func @transform_2(%arg0: i32) -> (i32, i32) {
    %c0_i32 = arith.constant 0 : i32
    %c0_i32_0 = arith.constant 0 : i32
    %c0_i32_1 = arith.constant 0 : i32
    return %c0_i32, %c0_i32_0 : i32, i32
  }
  func.func @transform_3(%arg0: i32) -> (i32, i32) {
    %c0_i32 = arith.constant 0 : i32
    %c0_i32_0 = arith.constant 0 : i32
    %c0_i32_1 = arith.constant 0 : i32
    return %c0_i32, %c0_i32_0 : i32, i32
  }
  func.func @transform_4(%arg0: i32) -> (i32, i32) {
    %c0_i32 = arith.constant 0 : i32
    %c0_i32_0 = arith.constant 0 : i32
    %c0_i32_1 = arith.constant 0 : i32
    return %c0_i32, %c0_i32_0 : i32, i32
  }
  func.func @transform_5(%arg0: i32) -> (i32, i32) {
    %c0_i32 = arith.constant 0 : i32
    %c0_i32_0 = arith.constant 0 : i32
    %c0_i32_1 = arith.constant 0 : i32
    return %c0_i32, %c0_i32_0 : i32, i32
  }
}

module attributes {stable_mosaic.version = 11 : i64} {
  func.func @_fc_kernel(%arg0: i32, %arg1: memref<8x128xf32, #tpu.memory_space<vmem>>, %arg2: memref<128x128xbf16, #tpu.memory_space<vmem>>, %arg3: memref<1x128xf32, #tpu.memory_space<vmem>>, %arg4: memref<8x128xf32, #tpu.memory_space<vmem>>) attributes {dimension_semantics = [#tpu.dimension_semantics<parallel>], iteration_bounds = array<i64: 1>, scalar_prefetch = 0 : i64, scratch_operands = 0 : i64, tpu.core_type = #tpu.core_type<tc>, window_params = [{pipeline_mode = #tpu.pipeline_mode<synchronous>, transform_indices = @transform_0, window_bounds = array<i64: 8, 128>}, {transform_indices = @transform_1, window_bounds = array<i64: 128, 128>}, {transform_indices = @transform_2, window_bounds = array<i64: 1, 128>}, {transform_indices = @transform_3, window_bounds = array<i64: 8, 128>}]} {
    %c0 = arith.constant 0 : index
    %c0_0 = arith.constant 0 : index
    %0 = vector.load %arg1[%c0, %c0_0] : memref<8x128xf32, #tpu.memory_space<vmem>>, vector<8x128xf32>
    %1 = arith.truncf %0 : vector<8x128xf32> to vector<8x128xbf16>
    %c0_1 = arith.constant 0 : index
    %c0_2 = arith.constant 0 : index
    %2 = vector.load %arg2[%c0_1, %c0_2] : memref<128x128xbf16, #tpu.memory_space<vmem>>, vector<128x128xbf16>
    %cst = arith.constant dense<0.000000e+00> : vector<8x128xf32>
    %3 = tpu.matmul %1, %2, %cst {dimension_numbers = #tpu.dot_dimension_numbers<[1], [0], [0], [1], [0, 0, 1, 1], [], []>} : vector<8x128xbf16>, vector<128x128xbf16>, vector<8x128xf32> -> vector<8x128xf32>
    %c0_3 = arith.constant 0 : index
    %c0_4 = arith.constant 0 : index
    %4 = vector.load %arg3[%c0_3, %c0_4] : memref<1x128xf32, #tpu.memory_space<vmem>>, vector<1x128xf32>
    %5 = vector.broadcast %4 : vector<1x128xf32> to vector<8x128xf32>
    %6 = arith.addf %3, %5 : vector<8x128xf32>
    %c0_5 = arith.constant 0 : index
    %c0_6 = arith.constant 0 : index
    %7 = vector.load %arg4[%c0_5, %c0_6] : memref<8x128xf32, #tpu.memory_space<vmem>>, vector<8x128xf32>
    tpu.vector_store %arg4[%c0_5, %c0_6], %6 {strides = array<i32>} : memref<8x128xf32, #tpu.memory_space<vmem>>, vector<8x128xf32>,
    return
  }
  func.func @transform_0(%arg0: i32) -> (i32, i32) {
    %c0_i32 = arith.constant 0 : i32
    %c0_i32_0 = arith.constant 0 : i32
    %c0_i32_1 = arith.constant 0 : i32
    return %c0_i32, %c0_i32_0 : i32, i32
  }
  func.func @transform_1(%arg0: i32) -> (i32, i32) {
    %c0_i32 = arith.constant 0 : i32
    %c0_i32_0 = arith.constant 0 : i32
    return %c0_i32, %arg0 : i32, i32
  }
  func.func @transform_2(%arg0: i32) -> (i32, i32) {
    %c0_i32 = arith.constant 0 : i32
    %c0_i32_0 = arith.constant 0 : i32
    return %c0_i32, %arg0 : i32, i32
  }
  func.func @transform_3(%arg0: i32) -> (i32, i32) {
    %c0_i32 = arith.constant 0 : i32
    %c0_i32_0 = arith.constant 0 : i32
    return %c0_i32, %arg0 : i32, i32
  }
}

</mosaic_0001>

<bundles_post_ra>
// kernel: lstm_forward.5
= control target key start
LH: loop header
LB: loop body
LE: loop exit
PB: predicated region body
PF: predicated region fallthrough
CT: control target
= control target key end

     0   :  { %s196_s1 = inlined_call_operand.vmem [shape: bf16[128,128], index: 1, kind: input, shape index: {}]   ;;  %s197_s2 = inlined_call_operand.vmem [shape: f32[1,128], index: 2, kind: input, shape index: {}]   ;;  %s198_s0 = inlined_call_operand.vmem [shape: f32[8,128], index: 0, kind: input, shape index: {}]   ;;  %s199_s3 = inlined_call_operand.vmem [shape: f32[8,128], index: 3, kind: output, shape index: {}]  }
   0x1   :  { %v141_v0 = vld [vmem:[%s196_s1 + $0x38] sm:$0xff]  ;;  %v140_v1 = vld [vmem:[%s196_s1 + $0x30] sm:$0xff]  ;;  %v139_v2 = vld [vmem:[%s196_s1 + $0x28] sm:$0xff] }
   0x2   :  { %84 = vmatpush.bf16.msra.mxu0 %v141_v0  ;;  %v138_v3 = vld [vmem:[%s196_s1 + $0x20] sm:$0xff]  ;;  %v137_v4 = vld [vmem:[%s196_s1 + $0x18] sm:$0xff]  ;;  %v136_v5 = vld [vmem:[%s196_s1 + $0x10] sm:$0xff] }
   0x3   :  { %v135_v6 = vld [vmem:[%s196_s1 + $0x8] sm:$0xff]  ;;  %v134_v7 = vld [vmem:[%s196_s1] sm:$0xff] }
   0x4   :  { %v14_v8 = vld [vmem:[%s198_s0] sm:$0xff] }
   0x5   :  { %v15_v9 = vpack.c.bf16 %v14_v8, %v14_v8  ;;  %v142_v10 = vld [vmem:[%s197_s2] ss:$0 sm:$0xff] }
   0x6   :  { %85 = vmatpush.bf16.msra.mxu0 %v140_v1 }
   0xa   :  { %86 = vmatpush.bf16.msra.mxu0 %v139_v2 }
   0xe   :  { %87 = vmatpush.bf16.msra.mxu0 %v138_v3 }
  0x12   :  { %88 = vmatpush.bf16.msra.mxu0 %v137_v4 }
  0x16   :  { %89 = vmatpush.bf16.msra.mxu0 %v136_v5 }
  0x1a   :  { %90 = vmatpush.bf16.msra.mxu0 %v135_v6 }
  0x1e   :  { %91 = vmatpush.bf16.msra.mxu0 %v134_v7 }
  0x21   :  { %92 = vmatmul.bf16.vlgmr.msra.gmra.mxu0 %v15_v9 }
  0x9e   :  { %v93_v11 = vpop.f32.mrf.mxu0 }
  0x9f   :  { %v94_v12 = vadd.f32 %v142_v10, %v93_v11 }
  0xa1   :  { %97 = vst [vmem:[%s199_s3] sm:$0xff] %v94_v12 }
  0xa6   :  { %v95_v13 = vpop.f32.mrf.mxu0 }

// kernel: lstm_forward.3
= control target key start
LH: loop header
LB: loop body
LE: loop exit
PB: predicated region body
PF: predicated region fallthrough
CT: control target
= control target key end

     0   :  { %s845_s12 = smov 0   ;;  %s1121_s0 = inlined_call_operand.vmem [shape: bf16[128,128], index: 0, kind: input, shape index: {}]   ;;  %s1122_s1 = inlined_call_operand.vmem [shape: bf16[128,512], index: 1, kind: input, shape index: {}]   ;;  %s1123_s2 = inlined_call_operand.vmem [shape: f32[1,512], index: 2, kind: input, shape index: {}]   ;;  %s1124_s3 = inlined_call_operand.vmem [shape: bf16[128,512], index: 3, kind: output, shape index: {}]  }
   0x1 LB: > { %s616_s13 = sadd.s32 4294967295, %s823_s12   ;;  %p620_p0 = scmp.ge.s32.totalorder %s823_s12, 1  ;;  %s823_s12 = sphi %s845_s12, %s13_s12  }
   0x2   : > { %p138_p1 = scmp.lt.s32.totalorder %s823_s12, 3 }
   0x4   : > { %p139_p2 = pnand %p620_p0, %p138_p1 }
   0x5   : > { %s621_s22 = sshll.u32 (!%p139_p2), %s616_s13, 3 }
   0x6   : > { %142 = sbr.rel (%p139_p2) target bundleno = 240 (0xf0), region = 32  ;;  %p164_p3 = scmp.lt.s32.totalorder (!%p139_p2), %s621_s22, 15 }
   0xb   : > { %v756_v0 = vld [vmem:[%s1122_s1 + $0xe0] sm:$0xf]  ;;  %v807_v1 = vld [vmem:[%s1122_s1 + $0xec] sm:$0xf0]  ;;  %v805_v2 = vld [vmem:[%s1122_s1 + $0xe4] sm:$0xf] }
   0xc   : > { %v757_v3 = vor.u32 %v807_v1, %v756_v0  ;;  %v758_v4 = vld [vmem:[%s1122_s1 + $0xf0] sm:$0xf0]  ;;  %v764_v5 = vld [vmem:[%s1122_s1 + $0xe8] sm:$0xf]  ;;  %v808_v6 = vld [vmem:[%s1122_s1 + $0xf4] sm:$0xf0] }
   0xd   : > { %v761_v7 = vor.u32 %v805_v2, %v758_v4  ;;  %v765_v8 = vor.u32 %v808_v6, %v764_v5  ;;  %v806_v9 = vld [vmem:[%s1122_s1 + $0xec] sm:$0xf]  ;;  %v766_v10 = vld [vmem:[%s1122_s1 + $0xf8] sm:$0xf0]  ;;  %v740_v11 = vld [vmem:[%s1122_s1 + $0xc0] sm:$0xf] }
   0xe   : > { %410 = vmatpush.bf16.msra.mxu0 %v757_v3  ;;  %v769_v12 = vor.u32 %v806_v9, %v766_v10  ;;  %v803_v13 = vld [vmem:[%s1122_s1 + $0xcc] sm:$0xf0]  ;;  %v801_v14 = vld [vmem:[%s1122_s1 + $0xc4] sm:$0xf]  ;;  %v742_v15 = vld [vmem:[%s1122_s1 + $0xd0] sm:$0xf0] }
   0xf   : > { %439 = vmatpush.bf16.msra.mxu1 %v761_v7  ;;  %468 = vmatpush.bf16.msra.mxu2 %v765_v8  ;;  %v741_v16 = vor.u32 %v803_v13, %v740_v11  ;;  %v745_v17 = vor.u32 %v801_v14, %v742_v15  ;;  %v748_v18 = vld [vmem:[%s1122_s1 + $0xc8] sm:$0xf]  ;;  %v804_v19 = vld [vmem:[%s1122_s1 + $0xd4] sm:$0xf0]  ;;  %v802_v20 = vld [vmem:[%s1122_s1 + $0xcc] sm:$0xf] }
  0x10   : > { %497 = vmatpush.bf16.msra.mxu3 %v769_v12  ;;  %v749_v21 = vor.u32 %v804_v19, %v748_v18  ;;  %v750_v22 = vld [vmem:[%s1122_s1 + $0xd8] sm:$0xf0]  ;;  %v724_v23 = vld [vmem:[%s1122_s1 + $0xa0] sm:$0xf]  ;;  %v799_v24 = vld [vmem:[%s1122_s1 + $0xac] sm:$0xf0] }
  0x11   : > { %v753_v25 = vor.u32 %v802_v20, %v750_v22  ;;  %v797_v26 = vld [vmem:[%s1122_s1 + $0xa4] sm:$0xf]  ;;  %v726_v27 = vld [vmem:[%s1122_s1 + $0xb0] sm:$0xf0]  ;;  %v732_v28 = vld [vmem:[%s1122_s1 + $0xa8] sm:$0xf]  ;;  %v725_v29 = vor.u32 %v799_v24, %v724_v23 }
  0x12   : > { %411 = vmatpush.bf16.msra.mxu0 %v741_v16  ;;  %v800_v30 = vld [vmem:[%s1122_s1 + $0xb4] sm:$0xf0]  ;;  %v798_v31 = vld [vmem:[%s1122_s1 + $0xac] sm:$0xf]  ;;  %v734_v32 = vld [vmem:[%s1122_s1 + $0xb8] sm:$0xf0]  ;;  %v729_v33 = vor.u32 %v797_v26, %v726_v27 }
  0x13   : > { %440 = vmatpush.bf16.msra.mxu1 %v745_v17  ;;  %469 = vmatpush.bf16.msra.mxu2 %v749_v21  ;;  %v733_v34 = vor.u32 %v800_v30, %v732_v28  ;;  %v708_v35 = vld [vmem:[%s1122_s1 + $0x80] sm:$0xf]  ;;  %v795_v36 = vld [vmem:[%s1122_s1 + $0x8c] sm:$0xf0]  ;;  %v793_v37 = vld [vmem:[%s1122_s1 + $0x84] sm:$0xf]  ;;  %v737_v38 = vor.u32 %v798_v31, %v734_v32 }
  0x14   : > { %498 = vmatpush.bf16.msra.mxu3 %v753_v25  ;;  %v710_v39 = vld [vmem:[%s1122_s1 + $0x90] sm:$0xf0]  ;;  %v716_v40 = vld [vmem:[%s1122_s1 + $0x88] sm:$0xf]  ;;  %v796_v41 = vld [vmem:[%s1122_s1 + $0x94] sm:$0xf0]  ;;  %v709_v44 = vor.u32 %v795_v36, %v708_v35 }
  0x15   : > { %v794_v42 = vld [vmem:[%s1122_s1 + $0x8c] sm:$0xf]  ;;  %v718_v43 = vld [vmem:[%s1122_s1 + $0x98] sm:$0xf0]  ;;  %v713_v45 = vor.u32 %v793_v37, %v710_v39  ;;  %v717_v46 = vor.u32 %v796_v41, %v716_v40  ;;  %v692_v47 = vld [vmem:[%s1122_s1 + $0x60] sm:$0xf] }
  0x16   : > { %412 = vmatpush.bf16.msra.mxu0 %v725_v29  ;;  %v791_v48 = vld [vmem:[%s1122_s1 + $0x6c] sm:$0xf0]  ;;  %v789_v49 = vld [vmem:[%s1122_s1 + $0x64] sm:$0xf]  ;;  %v721_v50 = vor.u32 %v794_v42, %v718_v43  ;;  %v694_v51 = vld [vmem:[%s1122_s1 + $0x70] sm:$0xf0] }
  0x17   : > { %441 = vmatpush.bf16.msra.mxu1 %v729_v33  ;;  %470 = vmatpush.bf16.msra.mxu2 %v733_v34  ;;  %v700_v52 = vld [vmem:[%s1122_s1 + $0x68] sm:$0xf]  ;;  %v792_v53 = vld [vmem:[%s1122_s1 + $0x74] sm:$0xf0]  ;;  %v790_v54 = vld [vmem:[%s1122_s1 + $0x6c] sm:$0xf]  ;;  %v693_v56 = vor.u32 %v791_v48, %v692_v47  ;;  %v697_v57 = vor.u32 %v789_v49, %v694_v51 }
  0x18   : > { %499 = vmatpush.bf16.msra.mxu3 %v737_v38  ;;  %v702_v55 = vld [vmem:[%s1122_s1 + $0x78] sm:$0xf0]  ;;  %v701_v58 = vor.u32 %v792_v53, %v700_v52  ;;  %v676_v59 = vld [vmem:[%s1122_s1 + $0x40] sm:$0xf]  ;;  %v787_v60 = vld [vmem:[%s1122_s1 + $0x4c] sm:$0xf0] }
  0x19   : > { %v785_v61 = vld [vmem:[%s1122_s1 + $0x44] sm:$0xf]  ;;  %v705_v62 = vor.u32 %v790_v54, %v702_v55  ;;  %v678_v63 = vld [vmem:[%s1122_s1 + $0x50] sm:$0xf0]  ;;  %v684_v0 = vld [vmem:[%s1122_s1 + $0x48] sm:$0xf]  ;;  %v677_v4 = vor.u32 %v787_v60, %v676_v59 }
  0x1a   : > { %413 = vmatpush.bf16.msra.mxu0 %v709_v44  ;;  %v788_v1 = vld [vmem:[%s1122_s1 + $0x54] sm:$0xf0]  ;;  %v786_v2 = vld [vmem:[%s1122_s1 + $0x4c] sm:$0xf]  ;;  %v686_v3 = vld [vmem:[%s1122_s1 + $0x58] sm:$0xf0]  ;;  %v681_v6 = vor.u32 %v785_v61, %v678_v63 }
  0x1b   : > { %442 = vmatpush.bf16.msra.mxu1 %v713_v45  ;;  %471 = vmatpush.bf16.msra.mxu2 %v717_v46  ;;  %v660_v5 = vld [vmem:[%s1122_s1 + $0x20] sm:$0xf]  ;;  %v685_v7 = vor.u32 %v788_v1, %v684_v0  ;;  %v783_v8 = vld [vmem:[%s1122_s1 + $0x2c] sm:$0xf0]  ;;  %v781_v9 = vld [vmem:[%s1122_s1 + $0x24] sm:$0xf]  ;;  %v689_v11 = vor.u32 %v786_v2, %v686_v3 }
  0x1c   : > { %500 = vmatpush.bf16.msra.mxu3 %v721_v50  ;;  %v662_v10 = vld [vmem:[%s1122_s1 + $0x30] sm:$0xf0]  ;;  %v668_v12 = vld [vmem:[%s1122_s1 + $0x28] sm:$0xf]  ;;  %v784_v13 = vld [vmem:[%s1122_s1 + $0x34] sm:$0xf0]  ;;  %v661_v16 = vor.u32 %v783_v8, %v660_v5 }
  0x1d   : > { %v782_v14 = vld [vmem:[%s1122_s1 + $0x2c] sm:$0xf]  ;;  %v670_v15 = vld [vmem:[%s1122_s1 + $0x38] sm:$0xf0]  ;;  %v644_v17 = vld [vmem:[%s1122_s1] sm:$0xf]  ;;  %v665_v18 = vor.u32 %v781_v9, %v662_v10  ;;  %v669_v19 = vor.u32 %v784_v13, %v668_v12 }
  0x1e   : > { %414 = vmatpush.bf16.msra.mxu0 %v693_v56  ;;  %v779_v20 = vld [vmem:[%s1122_s1 + $0xc] sm:$0xf0]  ;;  %v777_v21 = vld [vmem:[%s1122_s1 + $0x4] sm:$0xf]  ;;  %s1126_s22 = smov (!%p164_p3, %s621_s22), 15  ;;  %v673_v22 = vor.u32 %v782_v14, %v670_v15 }
  0x1f   : > { %443 = vmatpush.bf16.msra.mxu1 %v697_v57  ;;  %472 = vmatpush.bf16.msra.mxu2 %v701_v58  ;;  %v646_v23 = vld [vmem:[%s1122_s1 + $0x10] sm:$0xf0]  ;;  %v652_v24 = vld [vmem:[%s1122_s1 + $0x8] sm:$0xf]  ;;  %v780_v25 = vld [vmem:[%s1122_s1 + $0x14] sm:$0xf0]  ;;  %v645_v28 = vor.u32 %v779_v20, %v644_v17 }
  0x20   : > { %501 = vmatpush.bf16.msra.mxu3 %v705_v62  ;;  %v778_v26 = vld [vmem:[%s1122_s1 + $0xc] sm:$0xf]  ;;  %v654_v27 = vld [vmem:[%s1122_s1 + $0x18] sm:$0xf0]  ;;  %s622_s17 = sshll.u32 %s1126_s22, 2  ;;  %v649_v29 = vor.u32 %v777_v21, %v646_v23  ;;  %v653_v30 = vor.u32 %v780_v25, %v652_v24  ;;  %s772_s24 = sshll.u32 %s1126_s22, 4 }
  0x21   : > { %s167_s20 = scalar_lea.vmem %s1121_s0, %s622_s17  ;;  %v657_v31 = vor.u32 %v778_v26, %v654_v27  ;;  %v216_v36 = vld [vmem:[%s1123_s2] sm:$0xf]  ;;  %s1066_s27 = scalar_lea.vmem %s1124_s3, %s772_s24 }
  0x22   : > { %415 = vmatpush.bf16.msra.mxu0 %v677_v4  ;;  %v773_v32 = vld [vmem:[%s167_s20] sm:$0xff]  ;;  %v774_v33 = vld [vmem:[%s167_s20 + $0x8] sm:$0xff]  ;;  %v775_v34 = vld [vmem:[%s167_s20 + $0x10] sm:$0xff]  ;;  %v1056_v37 = vperm.slane %v216_v36, 0  ;;  %v1058_v38 = vperm.slane %v216_v36, 1  ;;  %v1068_v44 = vperm.slane %v216_v36, 2 }
  0x23   : > { %444 = vmatpush.bf16.msra.mxu1 %v681_v6  ;;  %473 = vmatpush.bf16.msra.mxu2 %v685_v7  ;;  %v776_v35 = vld [vmem:[%s167_s20 + $0x18] sm:$0xff]  ;;  %v1070_v45 = vperm.slane %v216_v36, 3 }
  0x24   : > { %502 = vmatpush.bf16.msra.mxu3 %v689_v11 }
  0x26   : > { %416 = vmatpush.bf16.msra.mxu0 %v661_v16 }
  0x27   : > { %445 = vmatpush.bf16.msra.mxu1 %v665_v18  ;;  %474 = vmatpush.bf16.msra.mxu2 %v669_v19 }
  0x28   : > { %503 = vmatpush.bf16.msra.mxu3 %v673_v22 }
  0x2a   : > { %417 = vmatpush.bf16.msra.mxu0 %v645_v28 }
  0x2b   : > { %446 = vmatpush.bf16.msra.mxu1 %v649_v29  ;;  %475 = vmatpush.bf16.msra.mxu2 %v653_v30 }
  0x2c   : > { %504 = vmatpush.bf16.msra.mxu3 %v657_v31 }
  0x2d   : > { %418 = vmatmul.bf16.vlgmr.msra.gmra.mxu0 %v773_v32 }
  0x2e   : > { %447 = vmatmul.bf16.vlgmr.msra.gmra.mxu1 %v773_v32  ;;  %476 = vmatmul.bf16.vlgmr.msra.gmra.mxu2 %v773_v32 }
  0x2f   : > { %505 = vmatmul.bf16.vlgmr.msra.gmra.mxu3 %v773_v32 }
  0x3d   : > { %423 = vmatmul.bf16.gmra.mxu0 %v774_v33 }
  0x3e   : > { %452 = vmatmul.bf16.gmra.mxu1 %v774_v33  ;;  %481 = vmatmul.bf16.gmra.mxu2 %v774_v33 }
  0x3f   : > { %510 = vmatmul.bf16.gmra.mxu3 %v774_v33 }
  0x4d   : > { %428 = vmatmul.bf16.gmra.mxu0 %v775_v34 }
  0x4e   : > { %457 = vmatmul.bf16.gmra.mxu1 %v775_v34  ;;  %486 = vmatmul.bf16.gmra.mxu2 %v775_v34 }
  0x4f   : > { %515 = vmatmul.bf16.gmra.mxu3 %v775_v34 }
  0x5d   : > { %433 = vmatmul.bf16.gmra.mxu0 %v776_v35 }
  0x5e   : > { %462 = vmatmul.bf16.gmra.mxu1 %v776_v35  ;;  %491 = vmatmul.bf16.gmra.mxu2 %v776_v35 }
  0x5f   : > { %520 = vmatmul.bf16.gmra.mxu3 %v776_v35 }
  0xaa   : > { %v419_v39 = vpop.f32.mrf.mxu0 }
  0xab   : > { %v420_v40 = vadd.f32 %v419_v39, %v1056_v37  ;;  %v448_v41 = vpop.f32.mrf.mxu1 }
  0xac   : > { %v449_v42 = vadd.f32 %v448_v41, %v1058_v38 }
  0xae   : > { %v526_v43 = vpack.c.bf16 %v449_v42, %v420_v40 }
  0xb0   : > { %542 = vst [vmem:[%s1066_s27] sm:$0xff] %v526_v43 }
  0xb1   : > { %v477_v46 = vpop.f32.mrf.mxu2 }
  0xb2   : > { %v478_v47 = vadd.f32 %v477_v46, %v1068_v44  ;;  %v506_v48 = vpop.f32.mrf.mxu3  ;;  %v421_v49 = vpop.f32.mrf.mxu0 }
  0xb3   : > { %v507_v50 = vadd.f32 %v506_v48, %v1070_v45  ;;  %v422_v51 = vadd.f32 %v421_v49, %v1056_v37  ;;  %v450_v52 = vpop.f32.mrf.mxu1 }
  0xb4   : > { %v451_v53 = vadd.f32 %v450_v52, %v1058_v38 }
  0xb5   : > { %v527_v54 = vpack.c.bf16 %v507_v50, %v478_v47 }
  0xb6   : > { %v528_v55 = vpack.c.bf16 %v451_v53, %v422_v51 }
  0xb7   : > { %543 = vst [vmem:[%s1066_s27 + $0x8] sm:$0xff] %v527_v54 }
  0xb8   : > { %544 = vst [vmem:[%s1066_s27 + $0x10] sm:$0xff] %v528_v55 }
  0xb9   : > { %v479_v56 = vpop.f32.mrf.mxu2 }
  0xba   : > { %v480_v57 = vadd.f32 %v479_v56, %v1068_v44  ;;  %v508_v58 = vpop.f32.mrf.mxu3  ;;  %v424_v59 = vpop.f32.mrf.mxu0 }
  0xbb   : > { %v509_v60 = vadd.f32 %v508_v58, %v1070_v45  ;;  %v425_v61 = vadd.f32 %v424_v59, %v1056_v37  ;;  %v453_v62 = vpop.f32.mrf.mxu1 }
  0xbc   : > { %v454_v63 = vadd.f32 %v453_v62, %v1058_v38 }
  0xbd   : > { %v529_v0 = vpack.c.bf16 %v509_v60, %v480_v57 }
  0xbe   : > { %v530_v1 = vpack.c.bf16 %v454_v63, %v425_v61 }
  0xbf   : > { %545 = vst [vmem:[%s1066_s27 + $0x18] sm:$0xff] %v529_v0 }
  0xc0   : > { %546 = vst [vmem:[%s1066_s27 + $0x20] sm:$0xff] %v530_v1 }
  0xc1   : > { %v482_v2 = vpop.f32.mrf.mxu2 }
  0xc2   : > { %v483_v3 = vadd.f32 %v482_v2, %v1068_v44  ;;  %v511_v4 = vpop.f32.mrf.mxu3  ;;  %v426_v5 = vpop.f32.mrf.mxu0 }
  0xc3   : > { %v512_v6 = vadd.f32 %v511_v4, %v1070_v45  ;;  %v427_v7 = vadd.f32 %v426_v5, %v1056_v37  ;;  %v455_v8 = vpop.f32.mrf.mxu1 }
  0xc4   : > { %v456_v9 = vadd.f32 %v455_v8, %v1058_v38 }
  0xc5   : > { %v531_v10 = vpack.c.bf16 %v512_v6, %v483_v3 }
  0xc6   : > { %v532_v11 = vpack.c.bf16 %v456_v9, %v427_v7 }
  0xc7   : > { %547 = vst [vmem:[%s1066_s27 + $0x28] sm:$0xff] %v531_v10 }
  0xc8   : > { %548 = vst [vmem:[%s1066_s27 + $0x30] sm:$0xff] %v532_v11 }
  0xc9   : > { %v484_v12 = vpop.f32.mrf.mxu2 }
  0xca   : > { %v485_v13 = vadd.f32 %v484_v12, %v1068_v44  ;;  %v513_v14 = vpop.f32.mrf.mxu3  ;;  %v429_v15 = vpop.f32.mrf.mxu0 }
  0xcb   : > { %v514_v16 = vadd.f32 %v513_v14, %v1070_v45  ;;  %v430_v17 = vadd.f32 %v429_v15, %v1056_v37  ;;  %v458_v18 = vpop.f32.mrf.mxu1 }
  0xcc   : > { %v459_v19 = vadd.f32 %v458_v18, %v1058_v38 }
  0xcd   : > { %v533_v20 = vpack.c.bf16 %v514_v16, %v485_v13 }
  0xce   : > { %v534_v21 = vpack.c.bf16 %v459_v19, %v430_v17 }
  0xcf   : > { %549 = vst [vmem:[%s1066_s27 + $0x38] sm:$0xff] %v533_v20 }
  0xd0   : > { %550 = vst [vmem:[%s1066_s27 + $0x40] sm:$0xff] %v534_v21 }
  0xd1   : > { %v487_v22 = vpop.f32.mrf.mxu2 }
  0xd2   : > { %v488_v23 = vadd.f32 %v487_v22, %v1068_v44  ;;  %v516_v24 = vpop.f32.mrf.mxu3  ;;  %v431_v25 = vpop.f32.mrf.mxu0 }
  0xd3   : > { %v517_v26 = vadd.f32 %v516_v24, %v1070_v45  ;;  %v432_v27 = vadd.f32 %v431_v25, %v1056_v37  ;;  %v460_v28 = vpop.f32.mrf.mxu1 }
  0xd4   : > { %v461_v29 = vadd.f32 %v460_v28, %v1058_v38 }
  0xd5   : > { %v535_v30 = vpack.c.bf16 %v517_v26, %v488_v23 }
  0xd6   : > { %v536_v31 = vpack.c.bf16 %v461_v29, %v432_v27 }
  0xd7   : > { %551 = vst [vmem:[%s1066_s27 + $0x48] sm:$0xff] %v535_v30 }
  0xd8   : > { %552 = vst [vmem:[%s1066_s27 + $0x50] sm:$0xff] %v536_v31 }
  0xd9   : > { %v489_v32 = vpop.f32.mrf.mxu2 }
  0xda   : > { %v490_v33 = vadd.f32 %v489_v32, %v1068_v44  ;;  %v518_v34 = vpop.f32.mrf.mxu3  ;;  %v434_v35 = vpop.f32.mrf.mxu0 }
  0xdb   : > { %v519_v36 = vadd.f32 %v518_v34, %v1070_v45  ;;  %v435_v39 = vadd.f32 %v434_v35, %v1056_v37  ;;  %v463_v40 = vpop.f32.mrf.mxu1 }
  0xdc   : > { %v464_v41 = vadd.f32 %v463_v40, %v1058_v38 }
  0xdd   : > { %v537_v42 = vpack.c.bf16 %v519_v36, %v490_v33 }
  0xde   : > { %v538_v43 = vpack.c.bf16 %v464_v41, %v435_v39 }
  0xdf   : > { %553 = vst [vmem:[%s1066_s27 + $0x58] sm:$0xff] %v537_v42 }
  0xe0   : > { %554 = vst [vmem:[%s1066_s27 + $0x60] sm:$0xff] %v538_v43 }
  0xe1   : > { %v492_v46 = vpop.f32.mrf.mxu2 }
  0xe2   : > { %v493_v47 = vadd.f32 %v492_v46, %v1068_v44  ;;  %v521_v48 = vpop.f32.mrf.mxu3  ;;  %v436_v49 = vpop.f32.mrf.mxu0 }
  0xe3   : > { %v522_v50 = vadd.f32 %v521_v48, %v1070_v45  ;;  %v437_v51 = vadd.f32 %v436_v49, %v1056_v37  ;;  %v465_v52 = vpop.f32.mrf.mxu1 }
  0xe4   : > { %v466_v53 = vadd.f32 %v465_v52, %v1058_v38 }
  0xe5   : > { %v539_v54 = vpack.c.bf16 %v522_v50, %v493_v47 }
  0xe6   : > { %v540_v55 = vpack.c.bf16 %v466_v53, %v437_v51 }
  0xe7   : > { %555 = vst [vmem:[%s1066_s27 + $0x68] sm:$0xff] %v539_v54 }
  0xe8   : > { %556 = vst [vmem:[%s1066_s27 + $0x70] sm:$0xff] %v540_v55 }
  0xe9   : > { %v494_v56 = vpop.f32.mrf.mxu2 }
  0xea   : > { %v495_v57 = vadd.f32 %v494_v56, %v1068_v44  ;;  %v523_v58 = vpop.f32.mrf.mxu3 }
  0xeb   : > { %v524_v59 = vadd.f32 %v523_v58, %v1070_v45 }
  0xed   : > { %v541_v60 = vpack.c.bf16 %v524_v59, %v495_v57 }
  0xef   : > { %557 = vst [vmem:[%s1066_s27 + $0x78] sm:$0xff] %v541_v60 }
  0xf0 PF: > { %s13_s12 = sadd.s32 1, %s823_s12  }
  0xf1   : > { %p10_p4 = scmp.ge.s32.totalorder %s13_s12, 4  }
  0xf3   :  { %12 = sbr.rel (!%p10_p4) target bundleno = 1 (0x1), region = 62 }

// kernel: lstm_forward.4
= control target key start
LH: loop header
LB: loop body
LE: loop exit
PB: predicated region body
PF: predicated region fallthrough
CT: control target
= control target key end

     0   :  { %s1841_s1 = inlined_call_operand.vmem [shape: bf16[128,512], index: 1, kind: input, shape index: {}]   ;;  %s1842_s2 = inlined_call_operand.vmem [shape: f32[8,128], index: 2, kind: input, shape index: {}]   ;;  %s1843_s0 = inlined_call_operand.vmem [shape: bf16[8,8,512], index: 0, kind: input, shape index: {}]   ;;  %s1844_s3 = inlined_call_operand.vmem [shape: f32[8,128], index: 3, kind: input, shape index: {}]   ;;  %s1845_s5 = inlined_call_operand.vmem [shape: f32[8,128], index: 5, kind: output, shape index: {1}]   ;;  %s1846_s4 = inlined_call_operand.vmem [shape: f32[8,128], index: 4, kind: output, shape index: {0}]  }
   0x1   :  { %v1031_v0 = vld [vmem:[%s1841_s1 + $0xe0] sm:$0xf]  ;;  %v1089_v1 = vld [vmem:[%s1841_s1 + $0xec] sm:$0xf0]  ;;  %v1087_v2 = vld [vmem:[%s1841_s1 + $0xe4] sm:$0xf] }
   0x2   :  { %v1258_v3 = vor.u32 %v1089_v1, %v1031_v0  ;;  %v1033_v4 = vld [vmem:[%s1841_s1 + $0xf0] sm:$0xf0]  ;;  %v1039_v5 = vld [vmem:[%s1841_s1 + $0xe8] sm:$0xf]  ;;  %v1090_v6 = vld [vmem:[%s1841_s1 + $0xf4] sm:$0xf0] }
   0x3   :  { %v1269_v7 = vor.u32 %v1087_v2, %v1033_v4  ;;  %v1271_v8 = vor.u32 %v1090_v6, %v1039_v5  ;;  %v1088_v9 = vld [vmem:[%s1841_s1 + $0xec] sm:$0xf]  ;;  %v1041_v10 = vld [vmem:[%s1841_s1 + $0xf8] sm:$0xf0]  ;;  %v1015_v11 = vld [vmem:[%s1841_s1 + $0xc0] sm:$0xf] }
   0x4   :  { %228 = vmatpush.bf16.msra.mxu0 %v1258_v3  ;;  %v1283_v12 = vor.u32 %v1088_v9, %v1041_v10  ;;  %v1085_v13 = vld [vmem:[%s1841_s1 + $0xcc] sm:$0xf0]  ;;  %v1083_v14 = vld [vmem:[%s1841_s1 + $0xc4] sm:$0xf]  ;;  %v1017_v15 = vld [vmem:[%s1841_s1 + $0xd0] sm:$0xf0] }
   0x5   :  { %241 = vmatpush.bf16.msra.mxu1 %v1269_v7  ;;  %254 = vmatpush.bf16.msra.mxu2 %v1271_v8  ;;  %v1296_v16 = vor.u32 %v1085_v13, %v1015_v11  ;;  %v1298_v17 = vor.u32 %v1083_v14, %v1017_v15  ;;  %v1023_v18 = vld [vmem:[%s1841_s1 + $0xc8] sm:$0xf]  ;;  %v1086_v19 = vld [vmem:[%s1841_s1 + $0xd4] sm:$0xf0]  ;;  %v1084_v20 = vld [vmem:[%s1841_s1 + $0xcc] sm:$0xf] }
   0x6   :  { %267 = vmatpush.bf16.msra.mxu3 %v1283_v12  ;;  %v1310_v21 = vor.u32 %v1086_v19, %v1023_v18  ;;  %v1025_v22 = vld [vmem:[%s1841_s1 + $0xd8] sm:$0xf0]  ;;  %v999_v23 = vld [vmem:[%s1841_s1 + $0xa0] sm:$0xf]  ;;  %v1081_v24 = vld [vmem:[%s1841_s1 + $0xac] sm:$0xf0] }
   0x7   :  { %v1321_v25 = vor.u32 %v1084_v20, %v1025_v22  ;;  %v1079_v26 = vld [vmem:[%s1841_s1 + $0xa4] sm:$0xf]  ;;  %v1001_v27 = vld [vmem:[%s1841_s1 + $0xb0] sm:$0xf0]  ;;  %v1007_v28 = vld [vmem:[%s1841_s1 + $0xa8] sm:$0xf]  ;;  %v1333_v29 = vor.u32 %v1081_v24, %v999_v23 }
   0x8   :  { %229 = vmatpush.bf16.msra.mxu0 %v1296_v16  ;;  %v1082_v30 = vld [vmem:[%s1841_s1 + $0xb4] sm:$0xf0]  ;;  %v1080_v31 = vld [vmem:[%s1841_s1 + $0xac] sm:$0xf]  ;;  %v1009_v32 = vld [vmem:[%s1841_s1 + $0xb8] sm:$0xf0]  ;;  %v1346_v33 = vor.u32 %v1079_v26, %v1001_v27 }
   0x9   :  { %242 = vmatpush.bf16.msra.mxu1 %v1298_v17  ;;  %255 = vmatpush.bf16.msra.mxu2 %v1310_v21  ;;  %v1348_v34 = vor.u32 %v1082_v30, %v1007_v28  ;;  %v983_v35 = vld [vmem:[%s1841_s1 + $0x80] sm:$0xf]  ;;  %v1077_v36 = vld [vmem:[%s1841_s1 + $0x8c] sm:$0xf0]  ;;  %v1075_v37 = vld [vmem:[%s1841_s1 + $0x84] sm:$0xf]  ;;  %v1360_v38 = vor.u32 %v1080_v31, %v1009_v32 }
   0xa   :  { %268 = vmatpush.bf16.msra.mxu3 %v1321_v25  ;;  %v985_v39 = vld [vmem:[%s1841_s1 + $0x90] sm:$0xf0]  ;;  %v991_v40 = vld [vmem:[%s1841_s1 + $0x88] sm:$0xf]  ;;  %v1078_v41 = vld [vmem:[%s1841_s1 + $0x94] sm:$0xf0]  ;;  %v1378_v44 = vor.u32 %v1077_v36, %v983_v35 }
   0xb   :  { %v1076_v42 = vld [vmem:[%s1841_s1 + $0x8c] sm:$0xf]  ;;  %v993_v43 = vld [vmem:[%s1841_s1 + $0x98] sm:$0xf0]  ;;  %v1382_v45 = vor.u32 %v1075_v37, %v985_v39  ;;  %v1384_v46 = vor.u32 %v1078_v41, %v991_v40  ;;  %v967_v47 = vld [vmem:[%s1841_s1 + $0x60] sm:$0xf] }
   0xc   :  { %230 = vmatpush.bf16.msra.mxu0 %v1333_v29  ;;  %v1073_v48 = vld [vmem:[%s1841_s1 + $0x6c] sm:$0xf0]  ;;  %v1071_v49 = vld [vmem:[%s1841_s1 + $0x64] sm:$0xf]  ;;  %v1396_v50 = vor.u32 %v1076_v42, %v993_v43  ;;  %v969_v51 = vld [vmem:[%s1841_s1 + $0x70] sm:$0xf0] }
   0xd   :  { %243 = vmatpush.bf16.msra.mxu1 %v1346_v33  ;;  %256 = vmatpush.bf16.msra.mxu2 %v1348_v34  ;;  %v975_v52 = vld [vmem:[%s1841_s1 + $0x68] sm:$0xf]  ;;  %v1074_v53 = vld [vmem:[%s1841_s1 + $0x74] sm:$0xf0]  ;;  %v1072_v54 = vld [vmem:[%s1841_s1 + $0x6c] sm:$0xf]  ;;  %v1414_v56 = vor.u32 %v1073_v48, %v967_v47  ;;  %v1418_v57 = vor.u32 %v1071_v49, %v969_v51 }
   0xe   :  { %269 = vmatpush.bf16.msra.mxu3 %v1360_v38  ;;  %v977_v55 = vld [vmem:[%s1841_s1 + $0x78] sm:$0xf0]  ;;  %v1420_v58 = vor.u32 %v1074_v53, %v975_v52  ;;  %v951_v59 = vld [vmem:[%s1841_s1 + $0x40] sm:$0xf]  ;;  %v1069_v60 = vld [vmem:[%s1841_s1 + $0x4c] sm:$0xf0] }
   0xf   :  { %v1067_v61 = vld [vmem:[%s1841_s1 + $0x44] sm:$0xf]  ;;  %v1432_v62 = vor.u32 %v1072_v54, %v977_v55  ;;  %v953_v63 = vld [vmem:[%s1841_s1 + $0x50] sm:$0xf0]  ;;  %v959_v0 = vld [vmem:[%s1841_s1 + $0x48] sm:$0xf]  ;;  %v1450_v5 = vor.u32 %v1069_v60, %v951_v59 }
  0x10   :  { %231 = vmatpush.bf16.msra.mxu0 %v1378_v44  ;;  %v1070_v1 = vld [vmem:[%s1841_s1 + $0x54] sm:$0xf0]  ;;  %v1068_v2 = vld [vmem:[%s1841_s1 + $0x4c] sm:$0xf]  ;;  %v961_v4 = vld [vmem:[%s1841_s1 + $0x58] sm:$0xf0]  ;;  %v1454_v6 = vor.u32 %v1067_v61, %v953_v63 }
  0x11   :  { %244 = vmatpush.bf16.msra.mxu1 %v1382_v45  ;;  %257 = vmatpush.bf16.msra.mxu2 %v1384_v46  ;;  %v1456_v9 = vor.u32 %v1070_v1, %v959_v0  ;;  %v935_v10 = vld [vmem:[%s1841_s1 + $0x20] sm:$0xf]  ;;  %v1065_v11 = vld [vmem:[%s1841_s1 + $0x2c] sm:$0xf0]  ;;  %v1063_v13 = vld [vmem:[%s1841_s1 + $0x24] sm:$0xf]  ;;  %v1468_v14 = vor.u32 %v1068_v2, %v961_v4 }
  0x12   :  { %270 = vmatpush.bf16.msra.mxu3 %v1396_v50  ;;  %v937_v15 = vld [vmem:[%s1841_s1 + $0x30] sm:$0xf0]  ;;  %v943_v18 = vld [vmem:[%s1841_s1 + $0x28] sm:$0xf]  ;;  %v1066_v19 = vld [vmem:[%s1841_s1 + $0x34] sm:$0xf0]  ;;  %v1486_v23 = vor.u32 %v1065_v11, %v935_v10 }
  0x13   :  { %v1064_v20 = vld [vmem:[%s1841_s1 + $0x2c] sm:$0xf]  ;;  %v945_v22 = vld [vmem:[%s1841_s1 + $0x38] sm:$0xf0]  ;;  %v1490_v24 = vor.u32 %v1063_v13, %v937_v15  ;;  %v1492_v26 = vor.u32 %v1066_v19, %v943_v18  ;;  %v919_v27 = vld [vmem:[%s1841_s1] sm:$0xf] }
  0x14   :  { %232 = vmatpush.bf16.msra.mxu0 %v1414_v56  ;;  %v1061_v28 = vld [vmem:[%s1841_s1 + $0xc] sm:$0xf0]  ;;  %v1059_v30 = vld [vmem:[%s1841_s1 + $0x4] sm:$0xf]  ;;  %v1504_v31 = vor.u32 %v1064_v20, %v945_v22  ;;  %v921_v32 = vld [vmem:[%s1841_s1 + $0x10] sm:$0xf0] }
  0x15   :  { %245 = vmatpush.bf16.msra.mxu1 %v1418_v57  ;;  %258 = vmatpush.bf16.msra.mxu2 %v1420_v58  ;;  %v927_v35 = vld [vmem:[%s1841_s1 + $0x8] sm:$0xf]  ;;  %v1062_v36 = vld [vmem:[%s1841_s1 + $0x14] sm:$0xf0]  ;;  %v1060_v37 = vld [vmem:[%s1841_s1 + $0xc] sm:$0xf]  ;;  %v1522_v40 = vor.u32 %v1061_v28, %v919_v27  ;;  %v1529_v42 = vor.u32 %v1059_v30, %v921_v32 }
  0x16   :  { %271 = vmatpush.bf16.msra.mxu3 %v1432_v62  ;;  %v929_v39 = vld [vmem:[%s1841_s1 + $0x18] sm:$0xf0]  ;;  %v23_v41 = vld [vmem:[%s1842_s2] sm:$0xff]  ;;  %v1531_v43 = vor.u32 %v1062_v36, %v927_v35  ;;  %v62_v60 = vld [vmem:[%s1843_s0 + $0x8] sm:$0xff] }
  0x17   :  { %v1534_v47 = vor.u32 %v1060_v37, %v929_v39  ;;  %v67_v48 = vpack.c.bf16 %v23_v41, %v23_v41  ;;  %v61_v49 = vld [vmem:[%s1843_s0] sm:$0xff]  ;;  %v66_v1 = vunpack.c.h.bf16 %v62_v60  ;;  %v65_v4 = vunpack.c.l.bf16 %v62_v60 }
  0x18   :  { %233 = vmatpush.bf16.msra.mxu0 %v1450_v5  ;;  %v63_v51 = vunpack.c.l.bf16 %v61_v49  ;;  %v64_v52 = vunpack.c.h.bf16 %v61_v49  ;;  %v25_v41 = vld [vmem:[%s1844_s3] sm:$0xff] }
  0x19   :  { %246 = vmatpush.bf16.msra.mxu1 %v1454_v6  ;;  %259 = vmatpush.bf16.msra.mxu2 %v1456_v9 }
  0x1a   :  { %272 = vmatpush.bf16.msra.mxu3 %v1468_v14 }
  0x1c   :  { %234 = vmatpush.bf16.msra.mxu0 %v1486_v23 }
  0x1d   :  { %247 = vmatpush.bf16.msra.mxu1 %v1490_v24  ;;  %260 = vmatpush.bf16.msra.mxu2 %v1492_v26 }
  0x1e   :  { %273 = vmatpush.bf16.msra.mxu3 %v1504_v31 }
  0x20   :  { %235 = vmatpush.bf16.msra.mxu0 %v1522_v40 }
  0x21   :  { %248 = vmatpush.bf16.msra.mxu1 %v1529_v42  ;;  %261 = vmatpush.bf16.msra.mxu2 %v1531_v43 }
  0x22   :  { %274 = vmatpush.bf16.msra.mxu3 %v1534_v47 }
  0x23   :  { %236 = vmatmul.bf16.vlgmr.msra.gmra.mxu0 %v67_v48 }
  0x24   :  { %313 = vmatpush.bf16.msrb.mxu0 %v1258_v3  ;;  %249 = vmatmul.bf16.vlgmr.msra.gmra.mxu1 %v67_v48 }
  0x25   :  { %326 = vmatpush.bf16.msrb.mxu1 %v1269_v7  ;;  %262 = vmatmul.bf16.vlgmr.msra.gmra.mxu2 %v67_v48 }
  0x26   :  { %275 = vmatmul.bf16.vlgmr.msra.gmra.mxu3 %v67_v48  ;;  %339 = vmatpush.bf16.msrb.mxu2 %v1271_v8 }
  0x27   :  { %352 = vmatpush.bf16.msrb.mxu3 %v1283_v12 }
  0x28   :  { %314 = vmatpush.bf16.msrb.mxu0 %v1296_v16 }
  0x29   :  { %327 = vmatpush.bf16.msrb.mxu1 %v1298_v17 }
  0x2a   :  { %340 = vmatpush.bf16.msrb.mxu2 %v1310_v21 }
  0x2b   :  { %353 = vmatpush.bf16.msrb.mxu3 %v1321_v25 }
  0x2c   :  { %315 = vmatpush.bf16.msrb.mxu0 %v1333_v29 }
  0x2d   :  { %328 = vmatpush.bf16.msrb.mxu1 %v1346_v33 }
  0x2e   :  { %341 = vmatpush.bf16.msrb.mxu2 %v1348_v34 }
  0x2f   :  { %354 = vmatpush.bf16.msrb.mxu3 %v1360_v38 }
  0x30   :  { %316 = vmatpush.bf16.msrb.mxu0 %v1378_v44 }
  0x31   :  { %329 = vmatpush.bf16.msrb.mxu1 %v1382_v45 }
  0x32   :  { %342 = vmatpush.bf16.msrb.mxu2 %v1384_v46 }
  0x33   :  { %355 = vmatpush.bf16.msrb.mxu3 %v1396_v50 }
  0x34   :  { %317 = vmatpush.bf16.msrb.mxu0 %v1414_v56 }
  0x35   :  { %330 = vmatpush.bf16.msrb.mxu1 %v1418_v57 }
  0x36   :  { %343 = vmatpush.bf16.msrb.mxu2 %v1420_v58 }
  0x37   :  { %356 = vmatpush.bf16.msrb.mxu3 %v1432_v62 }
  0x38   :  { %318 = vmatpush.bf16.msrb.mxu0 %v1450_v5 }
  0x39   :  { %331 = vmatpush.bf16.msrb.mxu1 %v1454_v6 }
  0x3a   :  { %344 = vmatpush.bf16.msrb.mxu2 %v1456_v9 }
  0x3b   :  { %357 = vmatpush.bf16.msrb.mxu3 %v1468_v14 }
  0x3c   :  { %319 = vmatpush.bf16.msrb.mxu0 %v1486_v23 }
  0x3d   :  { %332 = vmatpush.bf16.msrb.mxu1 %v1490_v24 }
  0x3e   :  { %345 = vmatpush.bf16.msrb.mxu2 %v1492_v26 }
  0x3f   :  { %358 = vmatpush.bf16.msrb.mxu3 %v1504_v31 }
  0x40   :  { %320 = vmatpush.bf16.msrb.mxu0 %v1522_v40 }
  0x41   :  { %333 = vmatpush.bf16.msrb.mxu1 %v1529_v42 }
  0x42   :  { %346 = vmatpush.bf16.msrb.mxu2 %v1531_v43 }
  0x43   :  { %359 = vmatpush.bf16.msrb.mxu3 %v1534_v47 }
  0x44   :  { %398 = vmatpush.bf16.msra.mxu0 %v1258_v3 }
  0x45   :  { %411 = vmatpush.bf16.msra.mxu1 %v1269_v7 }
  0x46   :  { %424 = vmatpush.bf16.msra.mxu2 %v1271_v8 }
  0x47   :  { %437 = vmatpush.bf16.msra.mxu3 %v1283_v12 }
  0x48   :  { %399 = vmatpush.bf16.msra.mxu0 %v1296_v16 }
  0x49   :  { %412 = vmatpush.bf16.msra.mxu1 %v1298_v17 }
  0x4a   :  { %425 = vmatpush.bf16.msra.mxu2 %v1310_v21 }
  0x4b   :  { %438 = vmatpush.bf16.msra.mxu3 %v1321_v25 }
  0x4c   :  { %400 = vmatpush.bf16.msra.mxu0 %v1333_v29 }
  0x4d   :  { %413 = vmatpush.bf16.msra.mxu1 %v1346_v33 }
  0x4e   :  { %426 = vmatpush.bf16.msra.mxu2 %v1348_v34 }
  0x4f   :  { %439 = vmatpush.bf16.msra.mxu3 %v1360_v38 }
  0x50   :  { %401 = vmatpush.bf16.msra.mxu0 %v1378_v44 }
  0x51   :  { %414 = vmatpush.bf16.msra.mxu1 %v1382_v45 }
  0x52   :  { %427 = vmatpush.bf16.msra.mxu2 %v1384_v46 }
  0x53   :  { %440 = vmatpush.bf16.msra.mxu3 %v1396_v50 }
  0x54   :  { %402 = vmatpush.bf16.msra.mxu0 %v1414_v56 }
  0x55   :  { %415 = vmatpush.bf16.msra.mxu1 %v1418_v57 }
  0x56   :  { %428 = vmatpush.bf16.msra.mxu2 %v1420_v58 }
  0x57   :  { %441 = vmatpush.bf16.msra.mxu3 %v1432_v62 }
  0x58   :  { %403 = vmatpush.bf16.msra.mxu0 %v1450_v5 }
  0x59   :  { %416 = vmatpush.bf16.msra.mxu1 %v1454_v6 }
  0x5a   :  { %429 = vmatpush.bf16.msra.mxu2 %v1456_v9 }
  0x5b   :  { %442 = vmatpush.bf16.msra.mxu3 %v1468_v14 }
  0x5c   :  { %404 = vmatpush.bf16.msra.mxu0 %v1486_v23 }
  0x5d   :  { %417 = vmatpush.bf16.msra.mxu1 %v1490_v24 }
  0x5e   :  { %430 = vmatpush.bf16.msra.mxu2 %v1492_v26 }
  0x5f   :  { %443 = vmatpush.bf16.msra.mxu3 %v1504_v31 }
  0x60   :  { %405 = vmatpush.bf16.msra.mxu0 %v1522_v40 }
  0x61   :  { %418 = vmatpush.bf16.msra.mxu1 %v1529_v42 }
  0x62   :  { %431 = vmatpush.bf16.msra.mxu2 %v1531_v43 }
  0x63   :  { %444 = vmatpush.bf16.msra.mxu3 %v1534_v47 }
  0xa0   :  { %v237_v53 = vpop.f32.mrf.mxu0 }
  0xa1   :  { %v280_v54 = vadd.f32 %v237_v53, %v63_v51  ;;  %v250_v55 = vpop.f32.mrf.mxu1 }
  0xa2   :  { %v281_v59 = vadd.f32 %v250_v55, %v64_v52 }
  0xa3   :  { %v284_v61 = vsub.f32 0.0, %v280_v54 }
  0xa4   :  { %v289_v63 = vsub.f32 0.0, %v281_v59 }
  0xa5   :  { %v285_v0 = vmul.f32 1.442695, %v284_v61 }
  0xa6   :  { %v290_v2 = vmul.f32 1.442695, %v289_v63  ;;  %v1045_v63 = vld [vmem:[%s1843_s0 + $0x10] sm:$0xff] }
  0xa7   :  { %1091 = vpow2.f32 %v285_v0  ;;  %v308_v0 = vunpack.c.l.bf16 %v1045_v63 }
  0xa8   :  { %v263_v10 = vpop.f32.mrf.mxu2  ;;  %1093 = vpow2.f32 %v290_v2  ;;  %v239_v13 = vpop.f32.mrf.mxu0 }
  0xa9   :  { %v276_v11 = vpop.f32.mrf.mxu3  ;;  %v252_v18 = vpop.f32.mrf.mxu1  ;;  %v282_v19 = vadd.f32 %v263_v10, %v65_v4  ;;  %v1046_v13 = vld [vmem:[%s1843_s0 + $0x18] sm:$0xff] }
  0xaa   :  { %v283_v15 = vadd.f32 %v276_v11, %v66_v1  ;;  %v309_v1 = vunpack.c.h.bf16 %v1045_v63 }
  0xab   :  { %1095 = vtanh.f32 %v282_v19  ;;  %v311_v19 = vunpack.c.h.bf16 %v1046_v13 }
  0xac   :  { %v295_v20 = vsub.f32 0.0, %v283_v15 }
  0xad   :  { %v1092_v22 = vpop.eup %1091 }
  0xae   :  { %v296_v27 = vmul.f32 1.442695, %v295_v20  ;;  %v1094_v28 = vpop.eup %1093  ;;  %v287_v30 = vadd.f32 1.0, %v1092_v22 }
  0xaf   :  { %v292_v32 = vadd.f32 1.0, %v1094_v28 }
  0xb0   :  { %1097 = vpow2.f32 %v296_v27  ;;  %v265_v35 = vpop.f32.mrf.mxu2  ;;  %v310_v27 = vunpack.c.l.bf16 %v1046_v13 }
  0xb1   :  { %1099 = vrcp.f32 %v287_v30  ;;  %v278_v36 = vpop.f32.mrf.mxu3  ;;  %v1096_v37 = vpop.eup %1095 }
  0xb2   :  { %1101 = vrcp.f32 %v292_v32 }
  0xb6   :  { %v1098_v39 = vpop.eup %1097 }
  0xb7   :  { %v1100_v48 = vpop.eup %1099  ;;  %v298_v49 = vadd.f32 1.0, %v1098_v39 }
  0xb8   :  { %v1102_v51 = vpop.eup %1101  ;;  %v301_v52 = vmul.f32 %v1100_v48, %v1096_v37 }
  0xb9   :  { %v300_v53 = vmul.f32 %v1102_v51, %v25_v41  ;;  %1103 = vrcp.f32 %v298_v49 }
  0xbb   :  { %v1613_v54 = vadd.f32 %v301_v52, %v300_v53 }
  0xbd   :  { %1105 = vtanh.f32 %v1613_v54 }
  0xbf   :  { %v1104_v55 = vpop.eup %1103 }
  0xc3   :  { %v1106_v59 = vpop.eup %1105 }
  0xc4   :  { %v304_v60 = vmul.f32 %v1106_v59, %v1104_v55 }
  0xc6   :  { %v312_v61 = vpack.c.bf16 %v304_v60, %v304_v60 }
  0xc8   :  { %321 = vmatmul.bf16.vlgmr.msrb.gmra.mxu0 %v312_v61  ;;  %334 = vmatmul.bf16.vlgmr.msrb.gmra.mxu1 %v312_v61 }
  0xc9   :  { %347 = vmatmul.bf16.vlgmr.msrb.gmra.mxu2 %v312_v61  ;;  %360 = vmatmul.bf16.vlgmr.msrb.gmra.mxu3 %v312_v61 }
  0xca   :  { %483 = vmatpush.bf16.msrb.mxu0 %v1258_v3  ;;  %496 = vmatpush.bf16.msrb.mxu1 %v1269_v7 }
  0xcb   :  { %509 = vmatpush.bf16.msrb.mxu2 %v1271_v8  ;;  %522 = vmatpush.bf16.msrb.mxu3 %v1283_v12 }
  0xce   :  { %484 = vmatpush.bf16.msrb.mxu0 %v1296_v16  ;;  %497 = vmatpush.bf16.msrb.mxu1 %v1298_v17 }
  0xcf   :  { %510 = vmatpush.bf16.msrb.mxu2 %v1310_v21  ;;  %523 = vmatpush.bf16.msrb.mxu3 %v1321_v25 }
  0xd2   :  { %485 = vmatpush.bf16.msrb.mxu0 %v1333_v29  ;;  %498 = vmatpush.bf16.msrb.mxu1 %v1346_v33 }
  0xd3   :  { %511 = vmatpush.bf16.msrb.mxu2 %v1348_v34  ;;  %524 = vmatpush.bf16.msrb.mxu3 %v1360_v38 }
  0xd6   :  { %486 = vmatpush.bf16.msrb.mxu0 %v1378_v44  ;;  %499 = vmatpush.bf16.msrb.mxu1 %v1382_v45 }
  0xd7   :  { %512 = vmatpush.bf16.msrb.mxu2 %v1384_v46  ;;  %525 = vmatpush.bf16.msrb.mxu3 %v1396_v50 }
  0xda   :  { %487 = vmatpush.bf16.msrb.mxu0 %v1414_v56  ;;  %500 = vmatpush.bf16.msrb.mxu1 %v1418_v57 }
  0xdb   :  { %513 = vmatpush.bf16.msrb.mxu2 %v1420_v58  ;;  %526 = vmatpush.bf16.msrb.mxu3 %v1432_v62 }
  0xde   :  { %488 = vmatpush.bf16.msrb.mxu0 %v1450_v5  ;;  %501 = vmatpush.bf16.msrb.mxu1 %v1454_v6 }
  0xdf   :  { %514 = vmatpush.bf16.msrb.mxu2 %v1456_v9  ;;  %527 = vmatpush.bf16.msrb.mxu3 %v1468_v14 }
  0xe2   :  { %489 = vmatpush.bf16.msrb.mxu0 %v1486_v23  ;;  %502 = vmatpush.bf16.msrb.mxu1 %v1490_v24 }
  0xe3   :  { %515 = vmatpush.bf16.msrb.mxu2 %v1492_v26  ;;  %528 = vmatpush.bf16.msrb.mxu3 %v1504_v31 }
  0xe6   :  { %490 = vmatpush.bf16.msrb.mxu0 %v1522_v40  ;;  %503 = vmatpush.bf16.msrb.mxu1 %v1529_v42 }
  0xe7   :  { %516 = vmatpush.bf16.msrb.mxu2 %v1531_v43  ;;  %529 = vmatpush.bf16.msrb.mxu3 %v1534_v47 }
 0x145   :  { %v322_v2 = vpop.f32.mrf.mxu0  ;;  %v335_v4 = vpop.f32.mrf.mxu1 }
 0x146   :  { %v365_v10 = vadd.f32 %v322_v2, %v308_v0  ;;  %v366_v11 = vadd.f32 %v335_v4, %v309_v1 }
 0x148   :  { %v369_v15 = vsub.f32 0.0, %v365_v10  ;;  %v374_v18 = vsub.f32 0.0, %v366_v11 }
 0x14a   :  { %v370_v20 = vmul.f32 1.442695, %v369_v15  ;;  %v375_v22 = vmul.f32 1.442695, %v374_v18 }
 0x14c   :  { %1107 = vpow2.f32 %v370_v20  ;;  %v348_v28 = vpop.f32.mrf.mxu2  ;;  %v361_v30 = vpop.f32.mrf.mxu3 }
 0x14d   :  { %1109 = vpow2.f32 %v375_v22  ;;  %v368_v32 = vadd.f32 %v361_v30, %v311_v19  ;;  %v324_v35 = vpop.f32.mrf.mxu0  ;;  %v337_v36 = vpop.f32.mrf.mxu1  ;;  %v367_v39 = vadd.f32 %v348_v28, %v310_v27  ;;  %v1048_v30 = vld [vmem:[%s1843_s0 + $0x28] sm:$0xff] }
 0x14e   :  { %v396_v36 = vunpack.c.h.bf16 %v1048_v30 }
 0x14f   :  { %v380_v37 = vsub.f32 0.0, %v368_v32 }
 0x151   :  { %v381_v41 = vmul.f32 1.442695, %v380_v37 }
 0x152   :  { %v1108_v48 = vpop.eup %1107 }
 0x153   :  { %v1110_v49 = vpop.eup %1109  ;;  %v372_v51 = vadd.f32 1.0, %v1108_v48  ;;  %1111 = vpow2.f32 %v381_v41  ;;  %v395_v41 = vunpack.c.l.bf16 %v1048_v30 }
 0x154   :  { %v377_v52 = vadd.f32 1.0, %v1110_v49  ;;  %1113 = vtanh.f32 %v367_v39  ;;  %v350_v53 = vpop.f32.mrf.mxu2  ;;  %v363_v55 = vpop.f32.mrf.mxu3 }
 0x155   :  { %1115 = vrcp.f32 %v372_v51 }
 0x156   :  { %1117 = vrcp.f32 %v377_v52 }
 0x159   :  { %v1112_v59 = vpop.eup %1111 }
 0x15a   :  { %v1114_v60 = vpop.eup %1113  ;;  %v383_v1 = vadd.f32 1.0, %v1112_v59 }
 0x15b   :  { %v1116_v61 = vpop.eup %1115 }
 0x15c   :  { %v1118_v63 = vpop.eup %1117  ;;  %v386_v0 = vmul.f32 %v1116_v61, %v1114_v60  ;;  %1119 = vrcp.f32 %v383_v1 }
 0x15d   :  { %v385_v2 = vmul.f32 %v1118_v63, %v1613_v54  ;;  %v1047_v54 = vld [vmem:[%s1843_s0 + $0x20] sm:$0xff] }
 0x15e   :  { %v393_v18 = vunpack.c.l.bf16 %v1047_v54  ;;  %v394_v19 = vunpack.c.h.bf16 %v1047_v54 }
 0x15f   :  { %v1655_v4 = vadd.f32 %v386_v0, %v385_v2 }
 0x161   :  { %1121 = vtanh.f32 %v1655_v4 }
 0x162   :  { %v1120_v10 = vpop.eup %1119 }
 0x167   :  { %v1122_v11 = vpop.eup %1121 }
 0x168   :  { %v389_v13 = vmul.f32 %v1122_v11, %v1120_v10 }
 0x16a   :  { %v397_v15 = vpack.c.bf16 %v389_v13, %v389_v13 }
 0x16c   :  { %406 = vmatmul.bf16.vlgmr.msra.gmra.mxu0 %v397_v15  ;;  %419 = vmatmul.bf16.vlgmr.msra.gmra.mxu1 %v397_v15 }
 0x16d   :  { %432 = vmatmul.bf16.vlgmr.msra.gmra.mxu2 %v397_v15  ;;  %445 = vmatmul.bf16.vlgmr.msra.gmra.mxu3 %v397_v15 }
 0x16e   :  { %568 = vmatpush.bf16.msra.mxu0 %v1258_v3  ;;  %581 = vmatpush.bf16.msra.mxu1 %v1269_v7 }
 0x16f   :  { %594 = vmatpush.bf16.msra.mxu2 %v1271_v8  ;;  %607 = vmatpush.bf16.msra.mxu3 %v1283_v12 }
 0x172   :  { %569 = vmatpush.bf16.msra.mxu0 %v1296_v16  ;;  %582 = vmatpush.bf16.msra.mxu1 %v1298_v17 }
 0x173   :  { %595 = vmatpush.bf16.msra.mxu2 %v1310_v21  ;;  %608 = vmatpush.bf16.msra.mxu3 %v1321_v25 }
 0x176   :  { %570 = vmatpush.bf16.msra.mxu0 %v1333_v29  ;;  %583 = vmatpush.bf16.msra.mxu1 %v1346_v33 }
 0x177   :  { %596 = vmatpush.bf16.msra.mxu2 %v1348_v34  ;;  %609 = vmatpush.bf16.msra.mxu3 %v1360_v38 }
 0x17a   :  { %571 = vmatpush.bf16.msra.mxu0 %v1378_v44  ;;  %584 = vmatpush.bf16.msra.mxu1 %v1382_v45 }
 0x17b   :  { %597 = vmatpush.bf16.msra.mxu2 %v1384_v46  ;;  %610 = vmatpush.bf16.msra.mxu3 %v1396_v50 }
 0x17e   :  { %572 = vmatpush.bf16.msra.mxu0 %v1414_v56  ;;  %585 = vmatpush.bf16.msra.mxu1 %v1418_v57 }
 0x17f   :  { %598 = vmatpush.bf16.msra.mxu2 %v1420_v58  ;;  %611 = vmatpush.bf16.msra.mxu3 %v1432_v62 }
 0x182   :  { %573 = vmatpush.bf16.msra.mxu0 %v1450_v5  ;;  %586 = vmatpush.bf16.msra.mxu1 %v1454_v6 }
 0x183   :  { %599 = vmatpush.bf16.msra.mxu2 %v1456_v9  ;;  %612 = vmatpush.bf16.msra.mxu3 %v1468_v14 }
 0x186   :  { %574 = vmatpush.bf16.msra.mxu0 %v1486_v23  ;;  %587 = vmatpush.bf16.msra.mxu1 %v1490_v24 }
 0x187   :  { %600 = vmatpush.bf16.msra.mxu2 %v1492_v26  ;;  %613 = vmatpush.bf16.msra.mxu3 %v1504_v31 }
 0x18a   :  { %575 = vmatpush.bf16.msra.mxu0 %v1522_v40  ;;  %588 = vmatpush.bf16.msra.mxu1 %v1529_v42 }
 0x18b   :  { %601 = vmatpush.bf16.msra.mxu2 %v1531_v43  ;;  %614 = vmatpush.bf16.msra.mxu3 %v1534_v47 }
 0x1e9   :  { %v407_v20 = vpop.f32.mrf.mxu0  ;;  %v420_v22 = vpop.f32.mrf.mxu1 }
 0x1ea   :  { %v450_v27 = vadd.f32 %v407_v20, %v393_v18  ;;  %v451_v28 = vadd.f32 %v420_v22, %v394_v19 }
 0x1ec   :  { %v454_v32 = vsub.f32 0.0, %v450_v27  ;;  %v459_v35 = vsub.f32 0.0, %v451_v28 }
 0x1ee   :  { %v455_v37 = vmul.f32 1.442695, %v454_v32  ;;  %v460_v39 = vmul.f32 1.442695, %v459_v35 }
 0x1f0   :  { %1123 = vpow2.f32 %v455_v37  ;;  %v433_v48 = vpop.f32.mrf.mxu2  ;;  %v446_v49 = vpop.f32.mrf.mxu3 }
 0x1f1   :  { %1125 = vpow2.f32 %v460_v39  ;;  %v453_v51 = vadd.f32 %v446_v49, %v396_v36  ;;  %v409_v52 = vpop.f32.mrf.mxu0  ;;  %v422_v53 = vpop.f32.mrf.mxu1  ;;  %v452_v59 = vadd.f32 %v433_v48, %v395_v41  ;;  %v1050_v49 = vld [vmem:[%s1843_s0 + $0x38] sm:$0xff] }
 0x1f2   :  { %v481_v53 = vunpack.c.h.bf16 %v1050_v49 }
 0x1f3   :  { %v465_v55 = vsub.f32 0.0, %v453_v51 }
 0x1f5   :  { %v466_v60 = vmul.f32 1.442695, %v465_v55 }
 0x1f6   :  { %v1124_v61 = vpop.eup %1123 }
 0x1f7   :  { %v1126_v63 = vpop.eup %1125  ;;  %v457_v0 = vadd.f32 1.0, %v1124_v61  ;;  %1127 = vpow2.f32 %v466_v60  ;;  %v480_v60 = vunpack.c.l.bf16 %v1050_v49 }
 0x1f8   :  { %v462_v1 = vadd.f32 1.0, %v1126_v63  ;;  %1129 = vtanh.f32 %v452_v59  ;;  %v435_v2 = vpop.f32.mrf.mxu2  ;;  %v448_v10 = vpop.f32.mrf.mxu3 }
 0x1f9   :  { %1131 = vrcp.f32 %v457_v0 }
 0x1fa   :  { %1133 = vrcp.f32 %v462_v1 }
 0x1fd   :  { %v1128_v11 = vpop.eup %1127 }
 0x1fe   :  { %v1130_v13 = vpop.eup %1129  ;;  %v468_v19 = vadd.f32 1.0, %v1128_v11 }
 0x1ff   :  { %v1132_v15 = vpop.eup %1131 }
 0x200   :  { %v1134_v54 = vpop.eup %1133  ;;  %v471_v18 = vmul.f32 %v1132_v15, %v1130_v13  ;;  %1135 = vrcp.f32 %v468_v19 }
 0x201   :  { %v470_v20 = vmul.f32 %v1134_v54, %v1655_v4  ;;  %v1049_v4 = vld [vmem:[%s1843_s0 + $0x30] sm:$0xff] }
 0x202   :  { %v478_v35 = vunpack.c.l.bf16 %v1049_v4  ;;  %v479_v36 = vunpack.c.h.bf16 %v1049_v4 }
 0x203   :  { %v1697_v22 = vadd.f32 %v471_v18, %v470_v20 }
 0x205   :  { %1137 = vtanh.f32 %v1697_v22 }
 0x206   :  { %v1136_v27 = vpop.eup %1135 }
 0x20b   :  { %v1138_v28 = vpop.eup %1137 }
 0x20c   :  { %v474_v30 = vmul.f32 %v1138_v28, %v1136_v27 }
 0x20e   :  { %v482_v32 = vpack.c.bf16 %v474_v30, %v474_v30 }
 0x210   :  { %491 = vmatmul.bf16.vlgmr.msrb.gmra.mxu0 %v482_v32  ;;  %504 = vmatmul.bf16.vlgmr.msrb.gmra.mxu1 %v482_v32 }
 0x211   :  { %517 = vmatmul.bf16.vlgmr.msrb.gmra.mxu2 %v482_v32  ;;  %530 = vmatmul.bf16.vlgmr.msrb.gmra.mxu3 %v482_v32 }
 0x212   :  { %653 = vmatpush.bf16.msrb.mxu0 %v1258_v3  ;;  %666 = vmatpush.bf16.msrb.mxu1 %v1269_v7 }
 0x213   :  { %679 = vmatpush.bf16.msrb.mxu2 %v1271_v8  ;;  %692 = vmatpush.bf16.msrb.mxu3 %v1283_v12 }
 0x216   :  { %654 = vmatpush.bf16.msrb.mxu0 %v1296_v16  ;;  %667 = vmatpush.bf16.msrb.mxu1 %v1298_v17 }
 0x217   :  { %680 = vmatpush.bf16.msrb.mxu2 %v1310_v21  ;;  %693 = vmatpush.bf16.msrb.mxu3 %v1321_v25 }
 0x21a   :  { %655 = vmatpush.bf16.msrb.mxu0 %v1333_v29  ;;  %668 = vmatpush.bf16.msrb.mxu1 %v1346_v33 }
 0x21b   :  { %681 = vmatpush.bf16.msrb.mxu2 %v1348_v34  ;;  %694 = vmatpush.bf16.msrb.mxu3 %v1360_v38 }
 0x21e   :  { %656 = vmatpush.bf16.msrb.mxu0 %v1378_v44  ;;  %669 = vmatpush.bf16.msrb.mxu1 %v1382_v45 }
 0x21f   :  { %682 = vmatpush.bf16.msrb.mxu2 %v1384_v46  ;;  %695 = vmatpush.bf16.msrb.mxu3 %v1396_v50 }
 0x222   :  { %657 = vmatpush.bf16.msrb.mxu0 %v1414_v56  ;;  %670 = vmatpush.bf16.msrb.mxu1 %v1418_v57 }
 0x223   :  { %683 = vmatpush.bf16.msrb.mxu2 %v1420_v58  ;;  %696 = vmatpush.bf16.msrb.mxu3 %v1432_v62 }
 0x226   :  { %658 = vmatpush.bf16.msrb.mxu0 %v1450_v5  ;;  %671 = vmatpush.bf16.msrb.mxu1 %v1454_v6 }
 0x227   :  { %684 = vmatpush.bf16.msrb.mxu2 %v1456_v9  ;;  %697 = vmatpush.bf16.msrb.mxu3 %v1468_v14 }
 0x22a   :  { %659 = vmatpush.bf16.msrb.mxu0 %v1486_v23  ;;  %672 = vmatpush.bf16.msrb.mxu1 %v1490_v24 }
 0x22b   :  { %685 = vmatpush.bf16.msrb.mxu2 %v1492_v26  ;;  %698 = vmatpush.bf16.msrb.mxu3 %v1504_v31 }
 0x22e   :  { %660 = vmatpush.bf16.msrb.mxu0 %v1522_v40  ;;  %673 = vmatpush.bf16.msrb.mxu1 %v1529_v42 }
 0x22f   :  { %686 = vmatpush.bf16.msrb.mxu2 %v1531_v43  ;;  %699 = vmatpush.bf16.msrb.mxu3 %v1534_v47 }
 0x28d   :  { %v492_v37 = vpop.f32.mrf.mxu0  ;;  %v505_v39 = vpop.f32.mrf.mxu1 }
 0x28e   :  { %v535_v41 = vadd.f32 %v492_v37, %v478_v35  ;;  %v536_v48 = vadd.f32 %v505_v39, %v479_v36 }
 0x290   :  { %v539_v51 = vsub.f32 0.0, %v535_v41  ;;  %v544_v52 = vsub.f32 0.0, %v536_v48 }
 0x292   :  { %v540_v55 = vmul.f32 1.442695, %v539_v51  ;;  %v545_v59 = vmul.f32 1.442695, %v544_v52 }
 0x294   :  { %1139 = vpow2.f32 %v540_v55  ;;  %v518_v61 = vpop.f32.mrf.mxu2  ;;  %v531_v63 = vpop.f32.mrf.mxu3 }
 0x295   :  { %1141 = vpow2.f32 %v545_v59  ;;  %v538_v0 = vadd.f32 %v531_v63, %v481_v53  ;;  %v494_v1 = vpop.f32.mrf.mxu0  ;;  %v507_v2 = vpop.f32.mrf.mxu1  ;;  %v537_v11 = vadd.f32 %v518_v61, %v480_v60  ;;  %v1052_v63 = vld [vmem:[%s1843_s0 + $0x48] sm:$0xff] }
 0x296   :  { %v566_v2 = vunpack.c.h.bf16 %v1052_v63 }
 0x297   :  { %v550_v10 = vsub.f32 0.0, %v538_v0 }
 0x299   :  { %v551_v13 = vmul.f32 1.442695, %v550_v10 }
 0x29a   :  { %v1140_v15 = vpop.eup %1139 }
 0x29b   :  { %v1142_v54 = vpop.eup %1141  ;;  %v542_v18 = vadd.f32 1.0, %v1140_v15  ;;  %1143 = vpow2.f32 %v551_v13  ;;  %v565_v13 = vunpack.c.l.bf16 %v1052_v63 }
 0x29c   :  { %v547_v19 = vadd.f32 1.0, %v1142_v54  ;;  %1145 = vtanh.f32 %v537_v11  ;;  %v520_v20 = vpop.f32.mrf.mxu2  ;;  %v533_v27 = vpop.f32.mrf.mxu3 }
 0x29d   :  { %1147 = vrcp.f32 %v542_v18 }
 0x29e   :  { %1149 = vrcp.f32 %v547_v19 }
 0x2a1   :  { %v1144_v28 = vpop.eup %1143 }
 0x2a2   :  { %v1146_v30 = vpop.eup %1145  ;;  %v553_v36 = vadd.f32 1.0, %v1144_v28 }
 0x2a3   :  { %v1148_v32 = vpop.eup %1147 }
 0x2a4   :  { %v1150_v4 = vpop.eup %1149  ;;  %v556_v35 = vmul.f32 %v1148_v32, %v1146_v30  ;;  %1151 = vrcp.f32 %v553_v36 }
 0x2a5   :  { %v555_v37 = vmul.f32 %v1150_v4, %v1697_v22  ;;  %v1051_v22 = vld [vmem:[%s1843_s0 + $0x40] sm:$0xff] }
 0x2a6   :  { %v563_v52 = vunpack.c.l.bf16 %v1051_v22  ;;  %v564_v53 = vunpack.c.h.bf16 %v1051_v22 }
 0x2a7   :  { %v1739_v39 = vadd.f32 %v556_v35, %v555_v37 }
 0x2a9   :  { %1153 = vtanh.f32 %v1739_v39 }
 0x2aa   :  { %v1152_v41 = vpop.eup %1151 }
 0x2af   :  { %v1154_v48 = vpop.eup %1153 }
 0x2b0   :  { %v559_v49 = vmul.f32 %v1154_v48, %v1152_v41 }
 0x2b2   :  { %v567_v51 = vpack.c.bf16 %v559_v49, %v559_v49 }
 0x2b4   :  { %576 = vmatmul.bf16.vlgmr.msra.gmra.mxu0 %v567_v51  ;;  %589 = vmatmul.bf16.vlgmr.msra.gmra.mxu1 %v567_v51 }
 0x2b5   :  { %602 = vmatmul.bf16.vlgmr.msra.gmra.mxu2 %v567_v51  ;;  %615 = vmatmul.bf16.vlgmr.msra.gmra.mxu3 %v567_v51 }
 0x2b6   :  { %738 = vmatpush.bf16.msra.mxu0 %v1258_v3  ;;  %751 = vmatpush.bf16.msra.mxu1 %v1269_v7 }
 0x2b7   :  { %764 = vmatpush.bf16.msra.mxu2 %v1271_v8  ;;  %777 = vmatpush.bf16.msra.mxu3 %v1283_v12 }
 0x2ba   :  { %739 = vmatpush.bf16.msra.mxu0 %v1296_v16  ;;  %752 = vmatpush.bf16.msra.mxu1 %v1298_v17 }
 0x2bb   :  { %765 = vmatpush.bf16.msra.mxu2 %v1310_v21  ;;  %778 = vmatpush.bf16.msra.mxu3 %v1321_v25 }
 0x2be   :  { %740 = vmatpush.bf16.msra.mxu0 %v1333_v29  ;;  %753 = vmatpush.bf16.msra.mxu1 %v1346_v33 }
 0x2bf   :  { %766 = vmatpush.bf16.msra.mxu2 %v1348_v34  ;;  %779 = vmatpush.bf16.msra.mxu3 %v1360_v38 }
 0x2c2   :  { %741 = vmatpush.bf16.msra.mxu0 %v1378_v44  ;;  %754 = vmatpush.bf16.msra.mxu1 %v1382_v45 }
 0x2c3   :  { %767 = vmatpush.bf16.msra.mxu2 %v1384_v46  ;;  %780 = vmatpush.bf16.msra.mxu3 %v1396_v50 }
 0x2c6   :  { %742 = vmatpush.bf16.msra.mxu0 %v1414_v56  ;;  %755 = vmatpush.bf16.msra.mxu1 %v1418_v57 }
 0x2c7   :  { %768 = vmatpush.bf16.msra.mxu2 %v1420_v58  ;;  %781 = vmatpush.bf16.msra.mxu3 %v1432_v62 }
 0x2ca   :  { %743 = vmatpush.bf16.msra.mxu0 %v1450_v5  ;;  %756 = vmatpush.bf16.msra.mxu1 %v1454_v6 }
 0x2cb   :  { %769 = vmatpush.bf16.msra.mxu2 %v1456_v9  ;;  %782 = vmatpush.bf16.msra.mxu3 %v1468_v14 }
 0x2ce   :  { %744 = vmatpush.bf16.msra.mxu0 %v1486_v23  ;;  %757 = vmatpush.bf16.msra.mxu1 %v1490_v24 }
 0x2cf   :  { %770 = vmatpush.bf16.msra.mxu2 %v1492_v26  ;;  %783 = vmatpush.bf16.msra.mxu3 %v1504_v31 }
 0x2d2   :  { %745 = vmatpush.bf16.msra.mxu0 %v1522_v40  ;;  %758 = vmatpush.bf16.msra.mxu1 %v1529_v42 }
 0x2d3   :  { %771 = vmatpush.bf16.msra.mxu2 %v1531_v43  ;;  %784 = vmatpush.bf16.msra.mxu3 %v1534_v47 }
 0x331   :  { %v577_v55 = vpop.f32.mrf.mxu0  ;;  %v590_v59 = vpop.f32.mrf.mxu1 }
 0x332   :  { %v620_v60 = vadd.f32 %v577_v55, %v563_v52  ;;  %v621_v61 = vadd.f32 %v590_v59, %v564_v53 }
 0x334   :  { %v624_v0 = vsub.f32 0.0, %v620_v60  ;;  %v629_v1 = vsub.f32 0.0, %v621_v61 }
 0x336   :  { %v625_v10 = vmul.f32 1.442695, %v624_v0  ;;  %v630_v11 = vmul.f32 1.442695, %v629_v1 }
 0x338   :  { %1155 = vpow2.f32 %v625_v10  ;;  %v603_v15 = vpop.f32.mrf.mxu2  ;;  %v616_v54 = vpop.f32.mrf.mxu3 }
 0x339   :  { %1157 = vpow2.f32 %v630_v11  ;;  %v623_v18 = vadd.f32 %v616_v54, %v566_v2  ;;  %v579_v19 = vpop.f32.mrf.mxu0  ;;  %v592_v20 = vpop.f32.mrf.mxu1  ;;  %v622_v28 = vadd.f32 %v603_v15, %v565_v13 }
 0x33b   :  { %v635_v27 = vsub.f32 0.0, %v623_v18  ;;  %v1055_v18 = vld [vmem:[%s1843_s0 + $0x60] sm:$0xff] }
 0x33c   :  { %v733_v19 = vunpack.c.l.bf16 %v1055_v18  ;;  %v734_v20 = vunpack.c.h.bf16 %v1055_v18 }
 0x33d   :  { %v636_v30 = vmul.f32 1.442695, %v635_v27 }
 0x33e   :  { %v1156_v32 = vpop.eup %1155 }
 0x33f   :  { %v1158_v4 = vpop.eup %1157  ;;  %v627_v35 = vadd.f32 1.0, %v1156_v32  ;;  %1159 = vpow2.f32 %v636_v30 }
 0x340   :  { %v632_v36 = vadd.f32 1.0, %v1158_v4  ;;  %1161 = vtanh.f32 %v622_v28  ;;  %v605_v37 = vpop.f32.mrf.mxu2  ;;  %v618_v41 = vpop.f32.mrf.mxu3  ;;  %v1056_v4 = vld [vmem:[%s1843_s0 + $0x68] sm:$0xff] }
 0x341   :  { %1163 = vrcp.f32 %v627_v35  ;;  %v736_v37 = vunpack.c.h.bf16 %v1056_v4 }
 0x342   :  { %1165 = vrcp.f32 %v632_v36 }
 0x345   :  { %v1160_v48 = vpop.eup %1159 }
 0x346   :  { %v1162_v49 = vpop.eup %1161  ;;  %v638_v53 = vadd.f32 1.0, %v1160_v48 }
 0x347   :  { %v1164_v51 = vpop.eup %1163 }
 0x348   :  { %v1166_v22 = vpop.eup %1165  ;;  %v641_v52 = vmul.f32 %v1164_v51, %v1162_v49  ;;  %1167 = vrcp.f32 %v638_v53  ;;  %v735_v49 = vunpack.c.l.bf16 %v1056_v4 }
 0x349   :  { %v640_v55 = vmul.f32 %v1166_v22, %v1739_v39 }
 0x34b   :  { %v1781_v59 = vadd.f32 %v641_v52, %v640_v55 }
 0x34d   :  { %1169 = vtanh.f32 %v1781_v59 }
 0x34e   :  { %v1168_v60 = vpop.eup %1167 }
 0x353   :  { %v1170_v61 = vpop.eup %1169 }
 0x354   :  { %v644_v63 = vmul.f32 %v1170_v61, %v1168_v60 }
 0x356   :  { %v652_v0 = vpack.c.bf16 %v644_v63, %v644_v63 }
 0x358   :  { %661 = vmatmul.bf16.vlgmr.msrb.gmra.mxu0 %v652_v0  ;;  %674 = vmatmul.bf16.vlgmr.msrb.gmra.mxu1 %v652_v0 }
 0x359   :  { %687 = vmatmul.bf16.vlgmr.msrb.gmra.mxu2 %v652_v0  ;;  %700 = vmatmul.bf16.vlgmr.msrb.gmra.mxu3 %v652_v0 }
 0x35a   :  { %823 = vmatpush.bf16.msrb.mxu0 %v1258_v3  ;;  %836 = vmatpush.bf16.msrb.mxu1 %v1269_v7  ;;  %v1053_v3 = vld [vmem:[%s1843_s0 + $0x50] sm:$0xff] }
 0x35b   :  { %849 = vmatpush.bf16.msrb.mxu2 %v1271_v8  ;;  %862 = vmatpush.bf16.msrb.mxu3 %v1283_v12  ;;  %v648_v7 = vunpack.c.l.bf16 %v1053_v3  ;;  %v649_v8 = vunpack.c.h.bf16 %v1053_v3 }
 0x35e   :  { %824 = vmatpush.bf16.msrb.mxu0 %v1296_v16  ;;  %837 = vmatpush.bf16.msrb.mxu1 %v1298_v17 }
 0x35f   :  { %850 = vmatpush.bf16.msrb.mxu2 %v1310_v21  ;;  %863 = vmatpush.bf16.msrb.mxu3 %v1321_v25  ;;  %v1054_v25 = vld [vmem:[%s1843_s0 + $0x58] sm:$0xff] }
 0x362   :  { %825 = vmatpush.bf16.msrb.mxu0 %v1333_v29  ;;  %838 = vmatpush.bf16.msrb.mxu1 %v1346_v33 }
 0x363   :  { %851 = vmatpush.bf16.msrb.mxu2 %v1348_v34  ;;  %864 = vmatpush.bf16.msrb.mxu3 %v1360_v38  ;;  %v651_v34 = vunpack.c.h.bf16 %v1054_v25 }
 0x366   :  { %826 = vmatpush.bf16.msrb.mxu0 %v1378_v44  ;;  %839 = vmatpush.bf16.msrb.mxu1 %v1382_v45  ;;  %v650_v45 = vunpack.c.l.bf16 %v1054_v25 }
 0x367   :  { %852 = vmatpush.bf16.msrb.mxu2 %v1384_v46  ;;  %865 = vmatpush.bf16.msrb.mxu3 %v1396_v50 }
 0x36a   :  { %827 = vmatpush.bf16.msrb.mxu0 %v1414_v56  ;;  %840 = vmatpush.bf16.msrb.mxu1 %v1418_v57 }
 0x36b   :  { %853 = vmatpush.bf16.msrb.mxu2 %v1420_v58  ;;  %866 = vmatpush.bf16.msrb.mxu3 %v1432_v62 }
 0x36e   :  { %828 = vmatpush.bf16.msrb.mxu0 %v1450_v5  ;;  %841 = vmatpush.bf16.msrb.mxu1 %v1454_v6 }
 0x36f   :  { %854 = vmatpush.bf16.msrb.mxu2 %v1456_v9  ;;  %867 = vmatpush.bf16.msrb.mxu3 %v1468_v14 }
 0x372   :  { %829 = vmatpush.bf16.msrb.mxu0 %v1486_v23  ;;  %842 = vmatpush.bf16.msrb.mxu1 %v1490_v24 }
 0x373   :  { %855 = vmatpush.bf16.msrb.mxu2 %v1492_v26  ;;  %868 = vmatpush.bf16.msrb.mxu3 %v1504_v31 }
 0x376   :  { %830 = vmatpush.bf16.msrb.mxu0 %v1522_v40  ;;  %843 = vmatpush.bf16.msrb.mxu1 %v1529_v42 }
 0x377   :  { %856 = vmatpush.bf16.msrb.mxu2 %v1531_v43  ;;  %869 = vmatpush.bf16.msrb.mxu3 %v1534_v47 }
 0x3d5   :  { %v662_v12 = vpop.f32.mrf.mxu0  ;;  %v675_v16 = vpop.f32.mrf.mxu1 }
 0x3d6   :  { %v705_v17 = vadd.f32 %v662_v12, %v648_v7  ;;  %v706_v21 = vadd.f32 %v675_v16, %v649_v8 }
 0x3d8   :  { %v709_v29 = vsub.f32 0.0, %v705_v17  ;;  %v714_v33 = vsub.f32 0.0, %v706_v21 }
 0x3da   :  { %v710_v38 = vmul.f32 1.442695, %v709_v29  ;;  %v715_v44 = vmul.f32 1.442695, %v714_v33 }
 0x3dc   :  { %1171 = vpow2.f32 %v710_v38  ;;  %v688_v46 = vpop.f32.mrf.mxu2  ;;  %v701_v50 = vpop.f32.mrf.mxu3 }
 0x3dd   :  { %1173 = vpow2.f32 %v715_v44  ;;  %v708_v56 = vadd.f32 %v701_v50, %v651_v34  ;;  %v664_v57 = vpop.f32.mrf.mxu0  ;;  %v677_v58 = vpop.f32.mrf.mxu1  ;;  %v707_v5 = vadd.f32 %v688_v46, %v650_v45 }
 0x3df   :  { %v720_v62 = vsub.f32 0.0, %v708_v56  ;;  %v1057_v56 = vld [vmem:[%s1843_s0 + $0x70] sm:$0xff] }
 0x3e0   :  { %v818_v57 = vunpack.c.l.bf16 %v1057_v56  ;;  %v819_v58 = vunpack.c.h.bf16 %v1057_v56 }
 0x3e1   :  { %v721_v6 = vmul.f32 1.442695, %v720_v62 }
 0x3e2   :  { %v1172_v9 = vpop.eup %1171 }
 0x3e3   :  { %v1174_v14 = vpop.eup %1173  ;;  %v712_v23 = vadd.f32 1.0, %v1172_v9  ;;  %1175 = vpow2.f32 %v721_v6 }
 0x3e4   :  { %v717_v24 = vadd.f32 1.0, %v1174_v14  ;;  %1177 = vtanh.f32 %v707_v5  ;;  %v690_v26 = vpop.f32.mrf.mxu2  ;;  %v703_v31 = vpop.f32.mrf.mxu3  ;;  %v1058_v14 = vld [vmem:[%s1843_s0 + $0x78] sm:$0xff] }
 0x3e5   :  { %1179 = vrcp.f32 %v712_v23  ;;  %v821_v26 = vunpack.c.h.bf16 %v1058_v14 }
 0x3e6   :  { %1181 = vrcp.f32 %v717_v24 }
 0x3e9   :  { %v1176_v40 = vpop.eup %1175 }
 0x3ea   :  { %v1178_v42 = vpop.eup %1177  ;;  %v723_v1 = vadd.f32 1.0, %v1176_v40 }
 0x3eb   :  { %v1180_v43 = vpop.eup %1179 }
 0x3ec   :  { %v1182_v47 = vpop.eup %1181  ;;  %v726_v39 = vmul.f32 %v1180_v43, %v1178_v42  ;;  %1183 = vrcp.f32 %v723_v1  ;;  %v820_v42 = vunpack.c.l.bf16 %v1058_v14 }
 0x3ed   :  { %v725_v2 = vmul.f32 %v1182_v47, %v1781_v59 }
 0x3ef   :  { %v727_v10 = vadd.f32 %v726_v39, %v725_v2 }
 0x3f1   :  { %1185 = vtanh.f32 %v727_v10 }
 0x3f2   :  { %v1184_v11 = vpop.eup %1183 }
 0x3f7   :  { %v1186_v13 = vpop.eup %1185 }
 0x3f8   :  { %v729_v15 = vmul.f32 %v1186_v13, %v1184_v11 }
 0x3fa   :  { %v737_v54 = vpack.c.bf16 %v729_v15, %v729_v15 }
 0x3fc   :  { %746 = vmatmul.bf16.vlgmr.msra.gmra.mxu0 %v737_v54  ;;  %759 = vmatmul.bf16.vlgmr.msra.gmra.mxu1 %v737_v54 }
 0x3fd   :  { %772 = vmatmul.bf16.vlgmr.msra.gmra.mxu2 %v737_v54  ;;  %785 = vmatmul.bf16.vlgmr.msra.gmra.mxu3 %v737_v54 }
 0x479   :  { %v747_v27 = vpop.f32.mrf.mxu0  ;;  %v760_v28 = vpop.f32.mrf.mxu1 }
 0x47a   :  { %v790_v30 = vadd.f32 %v747_v27, %v733_v19  ;;  %v791_v32 = vadd.f32 %v760_v28, %v734_v20 }
 0x47c   :  { %v794_v35 = vsub.f32 0.0, %v790_v30  ;;  %v799_v36 = vsub.f32 0.0, %v791_v32 }
 0x47e   :  { %v795_v41 = vmul.f32 1.442695, %v794_v35  ;;  %v800_v48 = vmul.f32 1.442695, %v799_v36 }
 0x480   :  { %1187 = vpow2.f32 %v795_v41  ;;  %v773_v51 = vpop.f32.mrf.mxu2  ;;  %v786_v22 = vpop.f32.mrf.mxu3 }
 0x481   :  { %1189 = vpow2.f32 %v800_v48  ;;  %v793_v52 = vadd.f32 %v786_v22, %v736_v37  ;;  %v749_v53 = vpop.f32.mrf.mxu0  ;;  %v762_v55 = vpop.f32.mrf.mxu1  ;;  %v792_v60 = vadd.f32 %v773_v51, %v735_v49 }
 0x483   :  { %v805_v59 = vsub.f32 0.0, %v793_v52 }
 0x485   :  { %v806_v61 = vmul.f32 1.442695, %v805_v59 }
 0x486   :  { %v1188_v63 = vpop.eup %1187 }
 0x487   :  { %v1190_v0 = vpop.eup %1189  ;;  %v797_v3 = vadd.f32 1.0, %v1188_v63  ;;  %1191 = vpow2.f32 %v806_v61 }
 0x488   :  { %v802_v7 = vadd.f32 1.0, %v1190_v0  ;;  %1193 = vtanh.f32 %v792_v60  ;;  %v775_v8 = vpop.f32.mrf.mxu2  ;;  %v788_v12 = vpop.f32.mrf.mxu3 }
 0x489   :  { %1195 = vrcp.f32 %v797_v3 }
 0x48a   :  { %1197 = vrcp.f32 %v802_v7 }
 0x48d   :  { %v1192_v16 = vpop.eup %1191 }
 0x48e   :  { %v1194_v17 = vpop.eup %1193  ;;  %v808_v33 = vadd.f32 1.0, %v1192_v16 }
 0x48f   :  { %v1196_v21 = vpop.eup %1195 }
 0x490   :  { %v1198_v25 = vpop.eup %1197  ;;  %v811_v29 = vmul.f32 %v1196_v21, %v1194_v17  ;;  %1199 = vrcp.f32 %v808_v33 }
 0x491   :  { %v810_v34 = vmul.f32 %v1198_v25, %v727_v10 }
 0x493   :  { %v812_v38 = vadd.f32 %v811_v29, %v810_v34 }
 0x495   :  { %1201 = vtanh.f32 %v812_v38 }
 0x496   :  { %v1200_v44 = vpop.eup %1199 }
 0x49b   :  { %v1202_v45 = vpop.eup %1201 }
 0x49c   :  { %v814_v46 = vmul.f32 %v1202_v45, %v1200_v44 }
 0x49e   :  { %v822_v50 = vpack.c.bf16 %v814_v46, %v814_v46 }
 0x4a0   :  { %831 = vmatmul.bf16.vlgmr.msrb.gmra.mxu0 %v822_v50  ;;  %844 = vmatmul.bf16.vlgmr.msrb.gmra.mxu1 %v822_v50 }
 0x4a1   :  { %857 = vmatmul.bf16.vlgmr.msrb.gmra.mxu2 %v822_v50  ;;  %870 = vmatmul.bf16.vlgmr.msrb.gmra.mxu3 %v822_v50 }
 0x51d   :  { %v832_v62 = vpop.f32.mrf.mxu0  ;;  %v845_v5 = vpop.f32.mrf.mxu1 }
 0x51e   :  { %v875_v6 = vadd.f32 %v832_v62, %v818_v57  ;;  %v876_v9 = vadd.f32 %v845_v5, %v819_v58 }
 0x520   :  { %v879_v23 = vsub.f32 0.0, %v875_v6  ;;  %v884_v24 = vsub.f32 0.0, %v876_v9 }
 0x522   :  { %v880_v31 = vmul.f32 1.442695, %v879_v23  ;;  %v885_v40 = vmul.f32 1.442695, %v884_v24 }
 0x524   :  { %1203 = vpow2.f32 %v880_v31  ;;  %v858_v43 = vpop.f32.mrf.mxu2  ;;  %v871_v47 = vpop.f32.mrf.mxu3 }
 0x525   :  { %1205 = vpow2.f32 %v885_v40  ;;  %v878_v39 = vadd.f32 %v871_v47, %v821_v26  ;;  %v834_v1 = vpop.f32.mrf.mxu0  ;;  %v847_v2 = vpop.f32.mrf.mxu1  ;;  %v877_v11 = vadd.f32 %v858_v43, %v820_v42 }
 0x527   :  { %v890_v10 = vsub.f32 0.0, %v878_v39 }
 0x529   :  { %v891_v13 = vmul.f32 1.442695, %v890_v10 }
 0x52a   :  { %v1204_v15 = vpop.eup %1203 }
 0x52b   :  { %v1206_v54 = vpop.eup %1205  ;;  %v882_v18 = vadd.f32 1.0, %v1204_v15  ;;  %1207 = vpow2.f32 %v891_v13 }
 0x52c   :  { %v887_v19 = vadd.f32 1.0, %v1206_v54  ;;  %1209 = vtanh.f32 %v877_v11  ;;  %v860_v20 = vpop.f32.mrf.mxu2  ;;  %v873_v27 = vpop.f32.mrf.mxu3 }
 0x52d   :  { %1211 = vrcp.f32 %v882_v18 }
 0x52e   :  { %1213 = vrcp.f32 %v887_v19 }
 0x531   :  { %v1208_v28 = vpop.eup %1207 }
 0x532   :  { %v1210_v30 = vpop.eup %1209  ;;  %v893_v36 = vadd.f32 1.0, %v1208_v28 }
 0x533   :  { %v1212_v32 = vpop.eup %1211 }
 0x534   :  { %v1214_v4 = vpop.eup %1213  ;;  %v896_v35 = vmul.f32 %v1212_v32, %v1210_v30  ;;  %1215 = vrcp.f32 %v893_v36 }
 0x535   :  { %v895_v37 = vmul.f32 %v1214_v4, %v812_v38 }
 0x537   :  { %v897_v41 = vadd.f32 %v896_v35, %v895_v37 }
 0x539   :  { %1217 = vtanh.f32 %v897_v41  ;;  %908 = vst [vmem:[%s1845_s5] sm:$0xff] %v897_v41 }
 0x53a   :  { %v1216_v48 = vpop.eup %1215 }
 0x53f   :  { %v1218_v49 = vpop.eup %1217 }
 0x540   :  { %v899_v51 = vmul.f32 %v1218_v49, %v1216_v48 }
 0x542   :  { %906 = vst [vmem:[%s1846_s4] sm:$0xff] %v899_v51 }

</bundles_post_ra>
